<compile_context>
chip_gen: v5e
topology: v5e:2x2
jax: 0.10.0
libtpu: 0.0.40
codegen_flags: <defaults>
</compile_context>

<pallas_src>
import jax
import jax.numpy as jnp
from jax.experimental import pallas as pl
from jax.experimental.pallas import tpu as pltpu

INPUT_SIZE = 28 * 28   # 784
HIDDEN_SIZE = 128


def _round_up(x, m):
    return ((x + m - 1) // m) * m


def discriminator_kernel(x_ref, w1_ref, b1_ref, w2_ref, b2_ref, o_ref):
    # ---- Layer 1: Linear(784 -> 128) + ReLU --------------------------------
    # Cast activations to bf16 in VMEM (w1 arrives pre-cast) -> single-pass
    # bf16 MXU matmul; f32 accumulation preserves accuracy.
    x_bf16 = x_ref[...].astype(jnp.bfloat16)
    h = jnp.dot(x_bf16, w1_ref[...], preferred_element_type=jnp.float32)
    h = jnp.maximum(h + b1_ref[...], 0.0)            # bias + ReLU on the VPU (f32)

    # ---- Layer 2: Linear(128 -> 1) + Sigmoid -------------------------------
    # VPU multiply + XLU lane reduction (free filler while the MXU works on
    # the next tile's layer 1).
    logit = jnp.sum(h * w2_ref[...], axis=-1, keepdims=True) + b2_ref[0, 0]
    o_ref[...] = jax.nn.sigmoid(logit)                # exp on the EUP


def prepare_discriminator_params(w1, b1, w2, b2):
    """One-time parameter prep (hoisted out of the per-forward path).

    w1: (128, 784) PyTorch (out, in) -> (784, 128) bf16
    b1: (128,)                       -> (1, 128)   f32
    w2: (1, 128)                     -> (1, 128)   f32 (row, consumed by VPU reduce)
    b2: (1,)                         -> (1, 1)     f32 (SMEM scalar)
    """
    w1_t = jnp.transpose(jnp.asarray(w1)).astype(jnp.bfloat16)
    b1_2d = jnp.asarray(b1, jnp.float32).reshape(1, HIDDEN_SIZE)
    w2_row = jnp.asarray(w2, jnp.float32).reshape(1, HIDDEN_SIZE)
    b2_2d = jnp.asarray(b2, jnp.float32).reshape(1, 1)
    return w1_t, b1_2d, w2_row, b2_2d


def discriminator_forward(x, w1_t, b1_2d, w2_row, b2_2d, *, bm=512):
    """x: (B, 784); params as returned by prepare_discriminator_params.
    Returns (B, 1) f32 probabilities."""
    B, D = x.shape
    assert D == INPUT_SIZE

    x = x.astype(jnp.float32)
    # Batch tile: a multiple of 128 keeps every sublane/lane layout constraint
    # happy for both the f32 load and the in-kernel bf16 view.
    BM = min(bm, _round_up(B, 128))
    B_pad = _round_up(B, BM)
    if B_pad != B:
        x = jnp.pad(x, ((0, B_pad - B), (0, 0)))
    n_tiles = B_pad // BM

    flops = 2 * B_pad * D * HIDDEN_SIZE + 2 * B_pad * HIDDEN_SIZE
    bytes_accessed = (B_pad * D * 4            # x (f32 stream from HBM)
                      + D * HIDDEN_SIZE * 2    # w1 (bf16, resident)
                      + 2 * HIDDEN_SIZE * 4    # b1 + w2 row
                      + 4                      # b2 scalar
                      + B_pad * 4)             # output

    out = pl.pallas_call(
        discriminator_kernel,
        out_shape=jax.ShapeDtypeStruct((B_pad, 1), jnp.float32),
        grid=(n_tiles,),
        in_specs=[
            pl.BlockSpec((BM, D), lambda i: (i, 0)),                 # x tile (pipelined)
            pl.BlockSpec((D, HIDDEN_SIZE), lambda i: (0, 0)),        # w1 (VMEM-resident)
            pl.BlockSpec((1, HIDDEN_SIZE), lambda i: (0, 0)),        # b1 (resident)
            pl.BlockSpec((1, HIDDEN_SIZE), lambda i: (0, 0)),        # w2 row (resident)
            pl.BlockSpec(memory_space=pltpu.MemorySpace.SMEM),       # b2 scalar
        ],
        out_specs=pl.BlockSpec((BM, 1), lambda i: (i, 0)),
        compiler_params=pltpu.CompilerParams(
            dimension_semantics=("parallel",)),
        cost_estimate=pl.CostEstimate(
            flops=flops,
            transcendentals=B_pad,
            bytes_accessed=bytes_accessed),
    )(x, w1_t, b1_2d, w2_row, b2_2d)

    return out[:B]


# ----------------------------- references ------------------------------------
def reference_forward_f32(x, w1, b1, w2, b2):
    h = jnp.maximum(x @ w1.T + b1, 0.0)
    return jax.nn.sigmoid(h @ w2.T + b2)


def reference_forward_bf16(x, w1, b1, w2, b2):
    # Matches the kernel's precision: bf16 layer-1 operands, f32 accumulation,
    # f32 everywhere else.
    h = jnp.dot(x.astype(jnp.bfloat16), w1.T.astype(jnp.bfloat16),
                preferred_element_type=jnp.float32)
    h = jnp.maximum(h + b1.astype(jnp.float32), 0.0)
    return jax.nn.sigmoid(h @ w2.T.astype(jnp.float32) + b2.astype(jnp.float32))


if __name__ == "__main__":
    key = jax.random.PRNGKey(0)
    kx, k1, k2, k3, k4 = jax.random.split(key, 5)

    B = 8
    x = jax.random.normal(kx, (B, INPUT_SIZE), dtype=jnp.float32)

    # Deterministic parameter init (mimicking PyTorch Linear's uniform range).
    bound1 = 1.0 / (INPUT_SIZE ** 0.5)
    w1 = jax.random.uniform(k1, (HIDDEN_SIZE, INPUT_SIZE), minval=-bound1, maxval=bound1)
    b1 = jax.random.uniform(k2, (HIDDEN_SIZE,), minval=-bound1, maxval=bound1)
    bound2 = 1.0 / (HIDDEN_SIZE ** 0.5)
    w2 = jax.random.uniform(k3, (1, HIDDEN_SIZE), minval=-bound2, maxval=bound2)
    b2 = jax.random.uniform(k4, (1,), minval=-bound2, maxval=bound2)

    # One-time prep (transpose + bf16 cast hoisted out of the forward path).
    params = prepare_discriminator_params(w1, b1, w2, b2)

    out = discriminator_forward(x, *params)
    out = jax.block_until_ready(out)
    assert out.shape == (B, 1), out.shape

    # Tight check against a reference at matching (bf16 layer-1) precision.
    ref_bf16 = reference_forward_bf16(x, w1, b1, w2, b2)
    assert jnp.allclose(out, ref_bf16, atol=1e-4, rtol=1e-4), "mismatch vs bf16 reference"

    # Looser sanity check against the pure-f32 PyTorch-equivalent math.
    ref_f32 = reference_forward_f32(x, w1, b1, w2, b2)
    assert jnp.allclose(out, ref_f32, atol=1e-2, rtol=1e-2), "mismatch vs f32 reference"

    print("KERNEL_OK")
</pallas_src>

<mosaic_0001>
module attributes {stable_mosaic.version = 11 : i64} {
  func.func @discriminator_kernel(%arg0: i32, %arg1: memref<128x784xf32, #tpu.memory_space<vmem>>, %arg2: memref<784x128xbf16, #tpu.memory_space<vmem>>, %arg3: memref<1x128xf32, #tpu.memory_space<vmem>>, %arg4: memref<1x128xf32, #tpu.memory_space<vmem>>, %arg5: memref<1x1xf32, #tpu.memory_space<smem>>, %arg6: memref<128x1xf32, #tpu.memory_space<vmem>>) attributes {dimension_semantics = [#tpu.dimension_semantics<parallel>], iteration_bounds = array<i64: 1>, scalar_prefetch = 0 : i64, scratch_operands = 0 : i64, tpu.core_type = #tpu.core_type<tc>, window_params = [{transform_indices = @transform_0, window_bounds = array<i64: 128, 784>}, {pipeline_mode = #tpu.pipeline_mode<synchronous>, transform_indices = @transform_1, window_bounds = array<i64: 784, 128>}, {pipeline_mode = #tpu.pipeline_mode<synchronous>, transform_indices = @transform_2, window_bounds = array<i64: 1, 128>}, {pipeline_mode = #tpu.pipeline_mode<synchronous>, transform_indices = @transform_3, window_bounds = array<i64: 1, 128>}, {transform_indices = @transform_4, window_bounds = array<i64: 1, 1>}, {transform_indices = @transform_5, window_bounds = array<i64: 128, 1>}]} {
    %c0 = arith.constant 0 : index
    %c0_0 = arith.constant 0 : index
    %0 = vector.load %arg1[%c0, %c0_0] : memref<128x784xf32, #tpu.memory_space<vmem>>, vector<128x784xf32>
    %1 = arith.truncf %0 : vector<128x784xf32> to vector<128x784xbf16>
    %c0_1 = arith.constant 0 : index
    %c0_2 = arith.constant 0 : index
    %2 = vector.load %arg2[%c0_1, %c0_2] : memref<784x128xbf16, #tpu.memory_space<vmem>>, vector<784x128xbf16>
    %cst = arith.constant dense<0.000000e+00> : vector<128x128xf32>
    %3 = tpu.matmul %1, %2, %cst {dimension_numbers = #tpu.dot_dimension_numbers<[1], [0], [0], [1], [0, 0, 1, 1], [], []>} : vector<128x784xbf16>, vector<784x128xbf16>, vector<128x128xf32> -> vector<128x128xf32>
    %c0_3 = arith.constant 0 : index
    %c0_4 = arith.constant 0 : index
    %4 = vector.load %arg3[%c0_3, %c0_4] : memref<1x128xf32, #tpu.memory_space<vmem>>, vector<1x128xf32>
    %5 = vector.broadcast %4 : vector<1x128xf32> to vector<128x128xf32>
    %6 = arith.addf %3, %5 : vector<128x128xf32>
    %cst_5 = arith.constant 0.000000e+00 : f32
    %7 = vector.broadcast %cst_5 : f32 to vector<128x128xf32>
    %8 = arith.maximumf %6, %7 : vector<128x128xf32>
    %c0_6 = arith.constant 0 : index
    %c0_7 = arith.constant 0 : index
    %9 = vector.load %arg4[%c0_6, %c0_7] : memref<1x128xf32, #tpu.memory_space<vmem>>, vector<1x128xf32>
    %10 = vector.broadcast %9 : vector<1x128xf32> to vector<128x128xf32>
    %11 = arith.mulf %8, %10 : vector<128x128xf32>
    %cst_8 = arith.constant dense<0.000000e+00> : vector<128xf32>
    %12 = vector.multi_reduction <add>, %11, %cst_8 [1] : vector<128x128xf32> to vector<128xf32>
    %13 = vector.shape_cast %12 : vector<128xf32> to vector<128x1xf32>
    %c0_9 = arith.constant 0 : index
    %c0_10 = arith.constant 0 : index
    %14 = memref.load %arg5[%c0_9, %c0_10] : memref<1x1xf32, #tpu.memory_space<smem>>
    %15 = vector.broadcast %14 : f32 to vector<128x1xf32>
    %16 = arith.addf %13, %15 : vector<128x1xf32>
    %17 = arith.negf %16 : vector<128x1xf32>
    %18 = math.exp %17 : vector<128x1xf32>
    %cst_11 = arith.constant 1.000000e+00 : f32
    %19 = vector.broadcast %cst_11 : f32 to vector<128x1xf32>
    %20 = arith.addf %19, %18 : vector<128x1xf32>
    %21 = arith.divf %19, %20 : vector<128x1xf32>
    %c0_12 = arith.constant 0 : index
    %c0_13 = arith.constant 0 : index
    %22 = vector.load %arg6[%c0_12, %c0_13] : memref<128x1xf32, #tpu.memory_space<vmem>>, vector<128x1xf32>
    tpu.vector_store %arg6[%c0_12, %c0_13], %21 {strides = array<i32>} : memref<128x1xf32, #tpu.memory_space<vmem>>, vector<128x1xf32>,
    return
  }
  func.func @transform_0(%arg0: i32) -> (i32, i32) {
    %c0_i32 = arith.constant 0 : i32
    %c0_i32_0 = arith.constant 0 : i32
    return %arg0, %c0_i32 : i32, i32
  }
  func.func @transform_1(%arg0: i32) -> (i32, i32) {
    %c0_i32 = arith.constant 0 : i32
    %c0_i32_0 = arith.constant 0 : i32
    %c0_i32_1 = arith.constant 0 : i32
    return %c0_i32, %c0_i32_0 : i32, i32
  }
  func.func @transform_2(%arg0: i32) -> (i32, i32) {
    %c0_i32 = arith.constant 0 : i32
    %c0_i32_0 = arith.constant 0 : i32
    %c0_i32_1 = arith.constant 0 : i32
    return %c0_i32, %c0_i32_0 : i32, i32
  }
  func.func @transform_3(%arg0: i32) -> (i32, i32) {
    %c0_i32 = arith.constant 0 : i32
    %c0_i32_0 = arith.constant 0 : i32
    %c0_i32_1 = arith.constant 0 : i32
    return %c0_i32, %c0_i32_0 : i32, i32
  }
  func.func @transform_4(%arg0: i32) -> (i32, i32) {
    %c0_i32 = arith.constant 0 : i32
    %c0_i32_0 = arith.constant 0 : i32
    %c0_i32_1 = arith.constant 0 : i32
    return %c0_i32, %c0_i32_0 : i32, i32
  }
  func.func @transform_5(%arg0: i32) -> (i32, i32) {
    %c0_i32 = arith.constant 0 : i32
    %c0_i32_0 = arith.constant 0 : i32
    return %arg0, %c0_i32 : i32, i32
  }
}

</mosaic_0001>

<bundles_post_ra>
// kernel: tpu_custom_call.1
= control target key start
LH: loop header
LB: loop body
LE: loop exit
PB: predicated region body
PF: predicated region fallthrough
CT: control target
= control target key end

     0   :  { %vm586_vm0 = vcmask 130048   ;;  %vm1344_vm3 = vcmask 7168   ;;  %s2496_s1 = inlined_call_operand.vmem [shape: bf16[784,128], index: 1, kind: input, shape index: {}]   ;;  %s2497_s2 = inlined_call_operand.vmem [shape: f32[1,128], index: 2, kind: input, shape index: {}]   ;;  %s2498_s0 = inlined_call_operand.vmem [shape: f32[128,784], index: 0, kind: input, shape index: {}]   ;;  %s2499_s3 = inlined_call_operand.vmem [shape: f32[1,128], index: 3, kind: input, shape index: {}]   ;;  %s2500_s4 = inlined_call_operand.<no memory space> [shape: f32[1,1], index: 4, kind: input, shape index: {}]   ;;  %s2501_s5 = inlined_call_operand.vmem [shape: f32[128,1], index: 5, kind: output, shape index: {}]  }
   0x1   :  { %v1592_v0 = vld [vmem:[%s2496_s1 + $0x38] sm:$0xff]  ;;  %v1591_v3 = vld [vmem:[%s2496_s1 + $0x30] sm:$0xff]  ;;  %v1590_v6 = vld [vmem:[%s2496_s1 + $0x28] sm:$0xff] }
   0x2   :  { %v1760_v1 = vld [vmem:[%s2496_s1 + $0xb8] sm:$0xff]  ;;  %611 = vmatpush.bf16.msra.mxu0 %v1592_v0  ;;  %1634 = vmatpush.bf16.msra.mxu3 %v1592_v0  ;;  %v1775_v4 = vld [vmem:[%s2496_s1 + $0xb0] sm:$0xff]  ;;  %v1790_v7 = vld [vmem:[%s2496_s1 + $0xa8] sm:$0xff] }
   0x3   :  { %v1765_v2 = vld [vmem:[%s2496_s1 + $0x78] sm:$0xff]  ;;  %1650 = vmatpush.bf16.msra.mxu2 %v1760_v1  ;;  %v1780_v5 = vld [vmem:[%s2496_s1 + $0x70] sm:$0xff]  ;;  %v1795_v8 = vld [vmem:[%s2496_s1 + $0x68] sm:$0xff] }
   0x4   :  { %1642 = vmatpush.bf16.msra.mxu1 %v1765_v2  ;;  %v1589_v9 = vld [vmem:[%s2496_s1 + $0x20] sm:$0xff]  ;;  %v1588_v12 = vld [vmem:[%s2496_s1 + $0x18] sm:$0xff]  ;;  %v1587_v15 = vld [vmem:[%s2496_s1 + $0x10] sm:$0xff] }
   0x5   :  { %v1805_v10 = vld [vmem:[%s2496_s1 + $0xa0] sm:$0xff]  ;;  %v1820_v13 = vld [vmem:[%s2496_s1 + $0x98] sm:$0xff]  ;;  %v1835_v16 = vld [vmem:[%s2496_s1 + $0x90] sm:$0xff] }
   0x6   :  { %612 = vmatpush.bf16.msra.mxu0 %v1591_v3  ;;  %1635 = vmatpush.bf16.msra.mxu3 %v1591_v3  ;;  %v1810_v11 = vld [vmem:[%s2496_s1 + $0x60] sm:$0xff]  ;;  %v1825_v14 = vld [vmem:[%s2496_s1 + $0x58] sm:$0xff]  ;;  %v1840_v17 = vld [vmem:[%s2496_s1 + $0x50] sm:$0xff] }
   0x7   :  { %1651 = vmatpush.bf16.msra.mxu2 %v1775_v4  ;;  %v1586_v18 = vld [vmem:[%s2496_s1 + $0x8] sm:$0xff]  ;;  %v1585_v21 = vld [vmem:[%s2496_s1] sm:$0xff]  ;;  %v29_v25 = vld [vmem:[%s2498_s0 + $0x38] sm:$0xff] }
   0x8   :  { %1643 = vmatpush.bf16.msra.mxu1 %v1780_v5  ;;  %v1850_v19 = vld [vmem:[%s2496_s1 + $0x88] sm:$0xff]  ;;  %v1863_v22 = vld [vmem:[%s2496_s1 + $0x80] sm:$0xff]  ;;  %v57_v27 = vld [vmem:[%s2498_s0 + $0x118] sm:$0xff] }
   0x9   :  { %v1855_v20 = vld [vmem:[%s2496_s1 + $0x48] sm:$0xff]  ;;  %v1868_v23 = vld [vmem:[%s2496_s1 + $0x40] sm:$0xff]  ;;  %v52_v28 = vld [vmem:[%s2498_s0 + $0xf0] sm:$0xff] }
   0xa   :  { %613 = vmatpush.bf16.msra.mxu0 %v1590_v6  ;;  %1636 = vmatpush.bf16.msra.mxu3 %v1590_v6  ;;  %v22_v24 = vld [vmem:[%s2498_s0] sm:$0xff]  ;;  %v59_v29 = vld [vmem:[%s2498_s0 + $0x128] sm:$0xff]  ;;  %v1616_v32 = vld [vmem:[%s2496_s1 + $0xf8] sm:$0xff] }
   0xb   :  { %1652 = vmatpush.bf16.msra.mxu2 %v1790_v7  ;;  %v50_v26 = vld [vmem:[%s2498_s0 + $0xe0] sm:$0xff]  ;;  %v51_v30 = vld [vmem:[%s2498_s0 + $0xe8] sm:$0xff]  ;;  %v134_v33 = vpack.c.bf16 %v29_v25, %v22_v24  ;;  %v150_v35 = vpack.c.bf16 %v59_v29, %v52_v28  ;;  %v1632_v38 = vld [vmem:[%s2496_s1 + $0x178] sm:$0xff] }
   0xc   :  { %1644 = vmatpush.bf16.msra.mxu1 %v1795_v8  ;;  %v58_v31 = vld [vmem:[%s2498_s0 + $0x120] sm:$0xff]  ;;  %v148_v34 = vpack.c.bf16 %v57_v27, %v50_v26  ;;  %v1615_v39 = vld [vmem:[%s2496_s1 + $0xf0] sm:$0xff]  ;;  %v1614_v41 = vld [vmem:[%s2496_s1 + $0xe8] sm:$0xff] }
   0xd   :  { %v149_v36 = vpack.c.bf16 %v58_v31, %v51_v30  ;;  %v1633_v37 = vld [vmem:[%s2496_s1 + $0x180] sm:$0xff]  ;;  %v1631_v40 = vld [vmem:[%s2496_s1 + $0x170] sm:$0xff]  ;;  %v1630_v42 = vld [vmem:[%s2496_s1 + $0x168] sm:$0xff] }
   0xe   :  { %614 = vmatpush.bf16.msra.mxu0 %v1589_v9  ;;  %1637 = vmatpush.bf16.msra.mxu3 %v1589_v9  ;;  %v1613_v43 = vld [vmem:[%s2496_s1 + $0xe0] sm:$0xff]  ;;  %v36_v44 = vld [vmem:[%s2498_s0 + $0x70] sm:$0xff]  ;;  %v43_v45 = vld [vmem:[%s2498_s0 + $0xa8] sm:$0xff] }
   0xf   :  { %1653 = vmatpush.bf16.msra.mxu2 %v1805_v10  ;;  %v64_v46 = vld [vmem:[%s2498_s0 + $0x150] sm:$0xff]  ;;  %v71_v47 = vld [vmem:[%s2498_s0 + $0x188] sm:$0xff]  ;;  %v66_v48 = vld [vmem:[%s2498_s0 + $0x160] sm:$0xff]  ;;  %v141_v53 = vpack.c.bf16 %v43_v45, %v36_v44 }
  0x10   :  { %1645 = vmatpush.bf16.msra.mxu1 %v1810_v11  ;;  %v73_v49 = vld [vmem:[%s2498_s0 + $0x198] sm:$0xff]  ;;  %v72_v51 = vld [vmem:[%s2498_s0 + $0x190] sm:$0xff]  ;;  %v1629_v52 = vld [vmem:[%s2496_s1 + $0x160] sm:$0xff]  ;;  %v155_v54 = vpack.c.bf16 %v71_v47, %v64_v46 }
  0x11   :  { %v65_v50 = vld [vmem:[%s2498_s0 + $0x158] sm:$0xff]  ;;  %v157_v55 = vpack.c.bf16 %v73_v49, %v66_v48  ;;  %v1611_v59 = vld [vmem:[%s2496_s1 + $0xd0] sm:$0xff]  ;;  %v78_v60 = vld [vmem:[%s2498_s0 + $0x1c0] sm:$0xff] }
  0x12   :  { %615 = vmatpush.bf16.msra.mxu0 %v1588_v12  ;;  %1638 = vmatpush.bf16.msra.mxu3 %v1588_v12  ;;  %v156_v56 = vpack.c.bf16 %v72_v51, %v65_v50  ;;  %v1612_v57 = vld [vmem:[%s2496_s1 + $0xd8] sm:$0xff]  ;;  %v23_v62 = vld [vmem:[%s2498_s0 + $0x8] sm:$0xff]  ;;  %v30_v63 = vld [vmem:[%s2498_s0 + $0x40] sm:$0xff] }
  0x13   :  { %1654 = vmatpush.bf16.msra.mxu2 %v1820_v13  ;;  %v1628_v58 = vld [vmem:[%s2496_s1 + $0x158] sm:$0xff]  ;;  %v80_v0 = vld [vmem:[%s2498_s0 + $0x1d0] sm:$0xff]  ;;  %v79_v3 = vld [vmem:[%s2498_s0 + $0x1c8] sm:$0xff] }
  0x14   :  { %1646 = vmatpush.bf16.msra.mxu1 %v1825_v14  ;;  %v85_v61 = vld [vmem:[%s2498_s0 + $0x1f8] sm:$0xff]  ;;  %v1627_v12 = vld [vmem:[%s2496_s1 + $0x150] sm:$0xff]  ;;  %v1609_v27 = vld [vmem:[%s2496_s1 + $0xc0] sm:$0xff] }
  0x15   :  { %v162_v6 = vpack.c.bf16 %v85_v61, %v78_v60  ;;  %v1625_v28 = vld [vmem:[%s2496_s1 + $0x140] sm:$0xff]  ;;  %v31_v30 = vld [vmem:[%s2498_s0 + $0x48] sm:$0xff]  ;;  %v108_v31 = vld [vmem:[%s2498_s0 + $0x2b0] sm:$0xff] }
  0x16   :  { %616 = vmatpush.bf16.msra.mxu0 %v1587_v15  ;;  %1639 = vmatpush.bf16.msra.mxu3 %v1587_v15  ;;  %v99_v15 = vld [vmem:[%s2498_s0 + $0x268] sm:$0xff]  ;;  %v106_v29 = vld [vmem:[%s2498_s0 + $0x2a0] sm:$0xff]  ;;  %v45_v45 = vld [vmem:[%s2498_s0 + $0xb8] sm:$0xff] }
  0x17   :  { %1655 = vmatpush.bf16.msra.mxu2 %v1835_v16  ;;  %v38_v44 = vld [vmem:[%s2498_s0 + $0x80] sm:$0xff]  ;;  %v129_v47 = vld [vmem:[%s2498_s0 + $0x358] sm:$0xff]  ;;  %v128_v49 = vld [vmem:[%s2498_s0 + $0x350] sm:$0xff] }
  0x18   :  { %1647 = vmatpush.bf16.msra.mxu1 %v1840_v17  ;;  %v122_v46 = vld [vmem:[%s2498_s0 + $0x320] sm:$0xff]  ;;  %v121_v48 = vld [vmem:[%s2498_s0 + $0x318] sm:$0xff]  ;;  %v1619_v50 = vld [vmem:[%s2496_s1 + $0x110] sm:$0xff] }
  0x19   :  { %v33_v60 = vld [vmem:[%s2498_s0 + $0x58] sm:$0xff]  ;;  %v28_v61 = vld [vmem:[%s2498_s0 + $0x30] sm:$0xff] }
  0x1a   :  { %617 = vmatpush.bf16.msra.mxu0 %v1586_v18  ;;  %1640 = vmatpush.bf16.msra.mxu3 %v1586_v18  ;;  %v101_v18 = vld [vmem:[%s2498_s0 + $0x278] sm:$0xff] }
  0x1b   :  { %1656 = vmatpush.bf16.msra.mxu2 %v1850_v19 }
  0x1c   :  { %1648 = vmatpush.bf16.msra.mxu1 %v1855_v20 }
  0x1e   :  { %618 = vmatpush.bf16.msra.mxu0 %v1585_v21  ;;  %1641 = vmatpush.bf16.msra.mxu3 %v1585_v21  ;;  %v100_v21 = vld [vmem:[%s2498_s0 + $0x270] sm:$0xff] }
  0x1f   :  { %1657 = vmatpush.bf16.msra.mxu2 %v1863_v22 }
  0x20   :  { %1649 = vmatpush.bf16.msra.mxu1 %v1868_v23 }
  0x21   :  { %619 = vmatmul.bf16.vlgmr.msra.gmra.mxu0 %v134_v33  ;;  %629 = vmatmul.bf16.vlgmr.msra.gmra.mxu3 %v148_v34  ;;  %v107_v33 = vld [vmem:[%s2498_s0 + $0x2a8] sm:$0xff]  ;;  %v114_v34 = vld [vmem:[%s2498_s0 + $0x2e0] sm:$0xff] }
  0x22   :  { %758 = vmatpush.bf16.msrb.mxu3 %v1616_v32  ;;  %660 = vmatpush.bf16.msrb.mxu0 %v1765_v2  ;;  %v87_v2 = vld [vmem:[%s2498_s0 + $0x208] sm:$0xff] }
  0x23   :  { %727 = vmatmul.bf16.vlgmr.msra.gmra.mxu2 %v150_v35  ;;  %678 = vmatmul.bf16.vlgmr.msra.gmra.mxu1 %v149_v36  ;;  %v164_v9 = vpack.c.bf16 %v87_v2, %v80_v0  ;;  %v115_v32 = vld [vmem:[%s2498_s0 + $0x2e8] sm:$0xff]  ;;  %v1623_v35 = vld [vmem:[%s2496_s1 + $0x130] sm:$0xff]  ;;  %v34_v0 = vld [vmem:[%s2498_s0 + $0x60] sm:$0xff] }
  0x24   :  { %912 = vmatpush.bf16.msrb.mxu2 %v1633_v37  ;;  %856 = vmatpush.bf16.msrb.mxu1 %v1632_v38  ;;  %v177_v38 = vpack.c.bf16 %v114_v34, %v107_v33 }
  0x26   :  { %661 = vmatpush.bf16.msrb.mxu0 %v1780_v5  ;;  %759 = vmatpush.bf16.msrb.mxu3 %v1615_v39  ;;  %v86_v5 = vld [vmem:[%s2498_s0 + $0x200] sm:$0xff]  ;;  %v1622_v39 = vld [vmem:[%s2496_s1 + $0x128] sm:$0xff] }
  0x28   :  { %857 = vmatpush.bf16.msrb.mxu1 %v1631_v40  ;;  %v1621_v40 = vld [vmem:[%s2496_s1 + $0x120] sm:$0xff] }
  0x2a   :  { %662 = vmatpush.bf16.msrb.mxu0 %v1795_v8  ;;  %760 = vmatpush.bf16.msrb.mxu3 %v1614_v41  ;;  %v135_v8 = vpack.c.bf16 %v30_v63, %v23_v62  ;;  %v1620_v41 = vld [vmem:[%s2496_s1 + $0x118] sm:$0xff]  ;;  %v35_v62 = vld [vmem:[%s2498_s0 + $0x68] sm:$0xff] }
  0x2b   :  { %v27_v63 = vld [vmem:[%s2498_s0 + $0x28] sm:$0xff] }
  0x2c   :  { %858 = vmatpush.bf16.msrb.mxu1 %v1630_v42  ;;  %v120_v42 = vld [vmem:[%s2498_s0 + $0x310] sm:$0xff] }
  0x2e   :  { %663 = vmatpush.bf16.msrb.mxu0 %v1810_v11  ;;  %761 = vmatpush.bf16.msrb.mxu3 %v1613_v43  ;;  %v163_v11 = vpack.c.bf16 %v86_v5, %v79_v3  ;;  %v127_v43 = vld [vmem:[%s2498_s0 + $0x348] sm:$0xff]  ;;  %v140_v5 = vpack.c.bf16 %v35_v62, %v28_v61 }
  0x2f   :  { %v183_v51 = vpack.c.bf16 %v127_v43, %v120_v42  ;;  %v75_v42 = vld [vmem:[%s2498_s0 + $0x1a8] sm:$0xff]  ;;  %v70_v43 = vld [vmem:[%s2498_s0 + $0x180] sm:$0xff] }
  0x30   :  { %859 = vmatpush.bf16.msrb.mxu1 %v1629_v52  ;;  %v143_v52 = vpack.c.bf16 %v45_v45, %v38_v44  ;;  %v77_v44 = vld [vmem:[%s2498_s0 + $0x1b8] sm:$0xff] }
  0x31   :  { %624 = vmatmul.bf16.gmra.mxu0 %v141_v53  ;;  %634 = vmatmul.bf16.gmra.mxu3 %v155_v54  ;;  %v185_v53 = vpack.c.bf16 %v129_v47, %v122_v46  ;;  %v184_v54 = vpack.c.bf16 %v128_v49, %v121_v48  ;;  %v69_v45 = vld [vmem:[%s2498_s0 + $0x178] sm:$0xff]  ;;  %v76_v46 = vld [vmem:[%s2498_s0 + $0x1b0] sm:$0xff] }
  0x32   :  { %664 = vmatpush.bf16.msrb.mxu0 %v1825_v14  ;;  %762 = vmatpush.bf16.msrb.mxu3 %v1612_v57  ;;  %v1610_v14 = vld [vmem:[%s2496_s1 + $0xc8] sm:$0xff]  ;;  %v25_v57 = vld [vmem:[%s2498_s0 + $0x18] sm:$0xff] }
  0x33   :  { %732 = vmatmul.bf16.gmra.mxu2 %v157_v55  ;;  %683 = vmatmul.bf16.gmra.mxu1 %v156_v56  ;;  %v1618_v55 = vld [vmem:[%s2496_s1 + $0x108] sm:$0xff]  ;;  %v1617_v56 = vld [vmem:[%s2496_s1 + $0x100] sm:$0xff] }
  0x34   :  { %860 = vmatpush.bf16.msrb.mxu1 %v1628_v58  ;;  %v32_v58 = vld [vmem:[%s2498_s0 + $0x50] sm:$0xff] }
  0x35   :  { %v137_v2 = vpack.c.bf16 %v32_v58, %v25_v57 }
  0x36   :  { %665 = vmatpush.bf16.msrb.mxu0 %v1840_v17  ;;  %763 = vmatpush.bf16.msrb.mxu3 %v1611_v59  ;;  %v37_v17 = vld [vmem:[%s2498_s0 + $0x78] sm:$0xff]  ;;  %v26_v59 = vld [vmem:[%s2498_s0 + $0x20] sm:$0xff] }
  0x37   :  { %v138_v3 = vpack.c.bf16 %v33_v60, %v26_v59 }
  0x38   :  { %861 = vmatpush.bf16.msrb.mxu1 %v1627_v12  ;;  %v47_v12 = vld [vmem:[%s2498_s0 + $0xc8] sm:$0xff] }
  0x3a   :  { %666 = vmatpush.bf16.msrb.mxu0 %v1855_v20  ;;  %764 = vmatpush.bf16.msrb.mxu3 %v1610_v14  ;;  %v93_v20 = vld [vmem:[%s2498_s0 + $0x238] sm:$0xff]  ;;  %v42_v14 = vld [vmem:[%s2498_s0 + $0xa0] sm:$0xff] }
  0x3b   :  { %v170_v26 = vpack.c.bf16 %v100_v21, %v93_v20  ;;  %v53_v21 = vld [vmem:[%s2498_s0 + $0xf8] sm:$0xff] }
  0x3e   :  { %667 = vmatpush.bf16.msrb.mxu0 %v1868_v23  ;;  %765 = vmatpush.bf16.msrb.mxu3 %v1609_v27  ;;  %v55_v27 = vld [vmem:[%s2498_s0 + $0x108] sm:$0xff] }
  0x41   :  { %639 = vmatmul.bf16.gmra.mxu3 %v162_v6  ;;  %668 = vmatmul.bf16.vlgmr.msrb.gmra.mxu0 %v135_v8  ;;  %v139_v6 = vpack.c.bf16 %v34_v0, %v27_v63  ;;  %v39_v8 = vld [vmem:[%s2498_s0 + $0x88] sm:$0xff] }
  0x42   :  { %709 = vmatpush.bf16.msra.mxu0 %v1760_v1  ;;  %v92_v1 = vld [vmem:[%s2498_s0 + $0x230] sm:$0xff] }
  0x43   :  { %737 = vmatmul.bf16.gmra.mxu2 %v164_v9  ;;  %688 = vmatmul.bf16.gmra.mxu1 %v163_v11  ;;  %v169_v23 = vpack.c.bf16 %v99_v15, %v92_v1  ;;  %v46_v9 = vld [vmem:[%s2498_s0 + $0xc0] sm:$0xff]  ;;  %v40_v11 = vld [vmem:[%s2498_s0 + $0x90] sm:$0xff]  ;;  %v49_v1 = vld [vmem:[%s2498_s0 + $0xd8] sm:$0xff] }
  0x44   :  { %v41_v15 = vld [vmem:[%s2498_s0 + $0x98] sm:$0xff] }
  0x46   :  { %710 = vmatpush.bf16.msra.mxu0 %v1775_v4  ;;  %v44_v4 = vld [vmem:[%s2498_s0 + $0xb0] sm:$0xff] }
  0x47   :  { %v142_v24 = vpack.c.bf16 %v44_v4, %v37_v17  ;;  %v48_v17 = vld [vmem:[%s2498_s0 + $0xd0] sm:$0xff]  ;;  %v144_v4 = vpack.c.bf16 %v46_v9, %v39_v8  ;;  %v91_v9 = vld [vmem:[%s2498_s0 + $0x228] sm:$0xff] }
  0x48   :  { %v146_v20 = vpack.c.bf16 %v48_v17, %v41_v15  ;;  %v84_v8 = vld [vmem:[%s2498_s0 + $0x1f0] sm:$0xff] }
  0x4a   :  { %711 = vmatpush.bf16.msra.mxu0 %v1790_v7  ;;  %v94_v7 = vld [vmem:[%s2498_s0 + $0x240] sm:$0xff] }
  0x4b   :  { %v171_v25 = vpack.c.bf16 %v101_v18, %v94_v7  ;;  %v145_v7 = vpack.c.bf16 %v47_v12, %v40_v11  ;;  %v147_v18 = vpack.c.bf16 %v49_v1, %v42_v14  ;;  %v83_v11 = vld [vmem:[%s2498_s0 + $0x1e8] sm:$0xff]  ;;  %v90_v12 = vld [vmem:[%s2498_s0 + $0x220] sm:$0xff] }
  0x4e   :  { %712 = vmatpush.bf16.msra.mxu0 %v1805_v10  ;;  %v1626_v10 = vld [vmem:[%s2496_s1 + $0x148] sm:$0xff] }
  0x4f   :  { %862 = vmatpush.bf16.msrb.mxu1 %v1626_v10  ;;  %v63_v10 = vld [vmem:[%s2498_s0 + $0x148] sm:$0xff] }
  0x51   :  { %644 = vmatmul.bf16.gmra.mxu3 %v169_v23  ;;  %673 = vmatmul.bf16.gmra.mxu0 %v142_v24  ;;  %v60_v23 = vld [vmem:[%s2498_s0 + $0x130] sm:$0xff]  ;;  %v54_v24 = vld [vmem:[%s2498_s0 + $0x100] sm:$0xff] }
  0x52   :  { %713 = vmatpush.bf16.msra.mxu0 %v1820_v13  ;;  %v1624_v13 = vld [vmem:[%s2496_s1 + $0x138] sm:$0xff] }
  0x53   :  { %742 = vmatmul.bf16.gmra.mxu2 %v171_v25  ;;  %693 = vmatmul.bf16.gmra.mxu1 %v170_v26  ;;  %v61_v25 = vld [vmem:[%s2498_s0 + $0x138] sm:$0xff]  ;;  %v56_v26 = vld [vmem:[%s2498_s0 + $0x110] sm:$0xff] }
  0x54   :  { %863 = vmatpush.bf16.msrb.mxu1 %v1625_v28  ;;  %v151_v28 = vpack.c.bf16 %v60_v23, %v53_v21 }
  0x56   :  { %714 = vmatpush.bf16.msra.mxu0 %v1835_v16  ;;  %v113_v16 = vld [vmem:[%s2498_s0 + $0x2d8] sm:$0xff] }
  0x57   :  { %v176_v36 = vpack.c.bf16 %v113_v16, %v106_v29  ;;  %v152_v29 = vpack.c.bf16 %v61_v25, %v54_v24 }
  0x5a   :  { %715 = vmatpush.bf16.msra.mxu0 %v1850_v19  ;;  %v24_v19 = vld [vmem:[%s2498_s0 + $0x10] sm:$0xff] }
  0x5b   :  { %v136_v37 = vpack.c.bf16 %v31_v30, %v24_v19  ;;  %v154_v19 = vpack.c.bf16 %v63_v10, %v56_v26 }
  0x5e   :  { %716 = vmatpush.bf16.msra.mxu0 %v1863_v22  ;;  %v178_v22 = vpack.c.bf16 %v115_v32, %v108_v31  ;;  %v2188_v32 = vld [vmem:[%s2497_s2] ss:$0 sm:$0xff] }
  0x61   :  { %649 = vmatmul.bf16.gmra.mxu3 %v176_v36  ;;  %717 = vmatmul.bf16.vlgmr.msra.gmra.mxu0 %v136_v37 }
  0x62   :  { %807 = vmatpush.bf16.msrb.mxu0 %v1624_v13  ;;  %v62_v13 = vld [vmem:[%s2498_s0 + $0x140] sm:$0xff] }
  0x63   :  { %747 = vmatmul.bf16.gmra.mxu2 %v178_v22  ;;  %698 = vmatmul.bf16.gmra.mxu1 %v177_v38  ;;  %v153_v30 = vpack.c.bf16 %v62_v13, %v55_v27 }
  0x66   :  { %808 = vmatpush.bf16.msrb.mxu0 %v1623_v35 }
  0x6a   :  { %809 = vmatpush.bf16.msrb.mxu0 %v1622_v39  ;;  %v67_v39 = vld [vmem:[%s2498_s0 + $0x168] sm:$0xff] }
  0x6e   :  { %810 = vmatpush.bf16.msrb.mxu0 %v1621_v40  ;;  %v74_v40 = vld [vmem:[%s2498_s0 + $0x1a0] sm:$0xff] }
  0x71   :  { %654 = vmatmul.bf16.gmra.mxu3 %v183_v51  ;;  %722 = vmatmul.bf16.gmra.mxu0 %v143_v52 }
  0x72   :  { %811 = vmatpush.bf16.msrb.mxu0 %v1620_v41  ;;  %v68_v41 = vld [vmem:[%s2498_s0 + $0x170] sm:$0xff] }
  0x73   :  { %752 = vmatmul.bf16.gmra.mxu2 %v185_v53  ;;  %703 = vmatmul.bf16.gmra.mxu1 %v184_v54  ;;  %v159_v51 = vpack.c.bf16 %v75_v42, %v68_v41  ;;  %v161_v53 = vpack.c.bf16 %v77_v44, %v70_v43  ;;  %v160_v54 = vpack.c.bf16 %v76_v46, %v69_v45 }
  0x76   :  { %812 = vmatpush.bf16.msrb.mxu0 %v1619_v50  ;;  %v158_v50 = vpack.c.bf16 %v74_v40, %v67_v39 }
  0x7a   :  { %813 = vmatpush.bf16.msrb.mxu0 %v1618_v55 }
  0x7e   :  { %814 = vmatpush.bf16.msrb.mxu0 %v1617_v56 }
  0x81   :  { %766 = vmatmul.bf16.vlgmr.msrb.gmra.mxu3 %v137_v2  ;;  %815 = vmatmul.bf16.vlgmr.msrb.gmra.mxu0 %v138_v3  ;;  %v81_v2 = vld [vmem:[%s2498_s0 + $0x1d8] sm:$0xff]  ;;  %v88_v3 = vld [vmem:[%s2498_s0 + $0x210] sm:$0xff] }
  0x82   :  { %v165_v17 = vpack.c.bf16 %v88_v3, %v81_v2  ;;  %v112_v2 = vld [vmem:[%s2498_s0 + $0x2d0] sm:$0xff]  ;;  %v119_v3 = vld [vmem:[%s2498_s0 + $0x308] sm:$0xff] }
  0x83   :  { %1561 = vmatmul.msk.bf16.vlgmr.msrb.gmra.mxu2 %vm586_vm0, %v140_v5  ;;  %864 = vmatmul.bf16.vlgmr.msrb.gmra.mxu1 %v139_v6  ;;  %v82_v5 = vld [vmem:[%s2498_s0 + $0x1e0] sm:$0xff]  ;;  %v89_v6 = vld [vmem:[%s2498_s0 + $0x218] sm:$0xff] }
  0x91   :  { %771 = vmatmul.bf16.gmra.mxu3 %v144_v4  ;;  %820 = vmatmul.bf16.gmra.mxu0 %v145_v7  ;;  %v166_v4 = vpack.c.bf16 %v89_v6, %v82_v5  ;;  %v111_v5 = vld [vmem:[%s2498_s0 + $0x2c8] sm:$0xff]  ;;  %v118_v6 = vld [vmem:[%s2498_s0 + $0x300] sm:$0xff] }
  0x93   :  { %1562 = vmatmul.msk.bf16.gmra.mxu2 %vm586_vm0, %v147_v18  ;;  %869 = vmatmul.bf16.gmra.mxu1 %v146_v20  ;;  %v168_v18 = vpack.c.bf16 %v91_v9, %v84_v8  ;;  %v167_v20 = vpack.c.bf16 %v90_v12, %v83_v11 }
  0x9e   :  { %v2183_v16 = vpop.f32.mrf.mxu0 }
  0xa0   :  { %v679_v31 = vpop.f32.mrf.mxu1 }
  0xa1   :  { %776 = vmatmul.bf16.gmra.mxu3 %v151_v28  ;;  %825 = vmatmul.bf16.gmra.mxu0 %v152_v29 }
  0xa3   :  { %1563 = vmatmul.msk.bf16.gmra.mxu2 %vm586_vm0, %v154_v19  ;;  %874 = vmatmul.bf16.gmra.mxu1 %v153_v30  ;;  %v95_v19 = vld [vmem:[%s2498_s0 + $0x248] sm:$0xff]  ;;  %v102_v30 = vld [vmem:[%s2498_s0 + $0x280] sm:$0xff] }
  0xa4   :  { %v630_v33 = vpop.f32.mrf.mxu3  ;;  %v172_v42 = vpack.c.bf16 %v102_v30, %v95_v19  ;;  %v123_v19 = vld [vmem:[%s2498_s0 + $0x328] sm:$0xff]  ;;  %v130_v30 = vld [vmem:[%s2498_s0 + $0x360] sm:$0xff] }
  0xa5   :  { %v631_v34 = vadd.f32 %v2188_v32, %v630_v33  ;;  %v103_v33 = vld [vmem:[%s2498_s0 + $0x288] sm:$0xff] }
  0xa6   :  { %v728_v35 = vpop.f32.mrf.mxu2  ;;  %v2192_v36 = vpop.f32.mrf.mxu0 }
  0xa7   :  { %v680_v37 = vadd.f32 %v679_v31, %v631_v34  ;;  %v96_v31 = vld [vmem:[%s2498_s0 + $0x250] sm:$0xff]  ;;  %v98_v34 = vld [vmem:[%s2498_s0 + $0x260] sm:$0xff] }
  0xa8   :  { %v681_v22 = vpop.f32.mrf.mxu1  ;;  %v173_v43 = vpack.c.bf16 %v103_v33, %v96_v31  ;;  %v124_v31 = vld [vmem:[%s2498_s0 + $0x330] sm:$0xff]  ;;  %v131_v33 = vld [vmem:[%s2498_s0 + $0x368] sm:$0xff] }
  0xa9   :  { %v2194_v38 = vadd.f32 %v728_v35, %v680_v37  ;;  %v105_v35 = vld [vmem:[%s2498_s0 + $0x298] sm:$0xff] }
  0xaa   :  { %v97_v37 = vld [vmem:[%s2498_s0 + $0x258] sm:$0xff]  ;;  %v175_v45 = vpack.c.bf16 %v105_v35, %v98_v34  ;;  %v126_v34 = vld [vmem:[%s2498_s0 + $0x340] sm:$0xff] }
  0xab   :  { %v133_v35 = vld [vmem:[%s2498_s0 + $0x378] sm:$0xff] }
  0xac   :  { %v632_v47 = vpop.f32.mrf.mxu3 }
  0xad   :  { %v633_v48 = vadd.f32 %v2188_v32, %v632_v47 }
  0xae   :  { %v730_v49 = vpop.f32.mrf.mxu2  ;;  %v2221_v52 = vpop.f32.mrf.mxu0 }
  0xaf   :  { %v682_v55 = vadd.f32 %v681_v22, %v633_v48  ;;  %v104_v22 = vld [vmem:[%s2498_s0 + $0x290] sm:$0xff] }
  0xb0   :  { %v684_v56 = vpop.f32.mrf.mxu1  ;;  %v174_v46 = vpack.c.bf16 %v104_v22, %v97_v37  ;;  %v125_v37 = vld [vmem:[%s2498_s0 + $0x338] sm:$0xff]  ;;  %v132_v22 = vld [vmem:[%s2498_s0 + $0x370] sm:$0xff] }
  0xb1   :  { %v2223_v57 = vadd.f32 %v730_v49, %v682_v55  ;;  %781 = vmatmul.bf16.gmra.mxu3 %v158_v50  ;;  %830 = vmatmul.bf16.gmra.mxu0 %v159_v51 }
  0xb3   :  { %1564 = vmatmul.msk.bf16.gmra.mxu2 %vm586_vm0, %v161_v53  ;;  %879 = vmatmul.bf16.gmra.mxu1 %v160_v54 }
  0xb4   :  { %v635_v58 = vpop.f32.mrf.mxu3 }
  0xb5   :  { %v636_v59 = vadd.f32 %v2188_v32, %v635_v58 }
  0xb6   :  { %v733_v60 = vpop.f32.mrf.mxu2  ;;  %v2227_v61 = vpop.f32.mrf.mxu0 }
  0xb7   :  { %v685_v62 = vadd.f32 %v684_v56, %v636_v59  ;;  %v109_v59 = vld [vmem:[%s2498_s0 + $0x2b8] sm:$0xff] }
  0xb8   :  { %v686_v63 = vpop.f32.mrf.mxu1 }
  0xb9   :  { %v2229_v0 = vadd.f32 %v733_v60, %v685_v62  ;;  %v116_v60 = vld [vmem:[%s2498_s0 + $0x2f0] sm:$0xff]  ;;  %v110_v62 = vld [vmem:[%s2498_s0 + $0x2c0] sm:$0xff] }
  0xba   :  { %v179_v12 = vpack.c.bf16 %v116_v60, %v109_v59 }
  0xbc   :  { %v637_v14 = vpop.f32.mrf.mxu3 }
  0xbd   :  { %v638_v1 = vadd.f32 %v2188_v32, %v637_v14 }
  0xbe   :  { %v735_v15 = vpop.f32.mrf.mxu2  ;;  %v2256_v7 = vpop.f32.mrf.mxu0 }
  0xbf   :  { %v687_v21 = vadd.f32 %v686_v63, %v638_v1  ;;  %v117_v63 = vld [vmem:[%s2498_s0 + $0x2f8] sm:$0xff] }
  0xc0   :  { %v689_v23 = vpop.f32.mrf.mxu1  ;;  %v180_v14 = vpack.c.bf16 %v117_v63, %v110_v62 }
  0xc1   :  { %v2258_v24 = vadd.f32 %v735_v15, %v687_v21  ;;  %786 = vmatmul.bf16.gmra.mxu3 %v165_v17  ;;  %835 = vmatmul.bf16.gmra.mxu0 %v166_v4  ;;  %v182_v15 = vpack.c.bf16 %v119_v3, %v112_v2  ;;  %v181_v17 = vpack.c.bf16 %v118_v6, %v111_v5 }
  0xc3   :  { %1565 = vmatmul.msk.bf16.gmra.mxu2 %vm586_vm0, %v168_v18  ;;  %884 = vmatmul.bf16.gmra.mxu1 %v167_v20 }
  0xc4   :  { %v640_v25 = vpop.f32.mrf.mxu3 }
  0xc5   :  { %v641_v26 = vadd.f32 %v2188_v32, %v640_v25 }
  0xc6   :  { %v738_v10 = vpop.f32.mrf.mxu2  ;;  %v2262_v27 = vpop.f32.mrf.mxu0 }
  0xc7   :  { %v690_v13 = vadd.f32 %v689_v23, %v641_v26 }
  0xc8   :  { %v691_v28 = vpop.f32.mrf.mxu1 }
  0xc9   :  { %v2264_v29 = vadd.f32 %v738_v10, %v690_v13 }
  0xcc   :  { %v642_v39 = vpop.f32.mrf.mxu3 }
  0xcd   :  { %v643_v40 = vadd.f32 %v2188_v32, %v642_v39 }
  0xce   :  { %v740_v41 = vpop.f32.mrf.mxu2  ;;  %v2291_v44 = vpop.f32.mrf.mxu0 }
  0xcf   :  { %v692_v47 = vadd.f32 %v691_v28, %v643_v40 }
  0xd0   :  { %v694_v48 = vpop.f32.mrf.mxu1 }
  0xd1   :  { %v2293_v49 = vadd.f32 %v740_v41, %v692_v47  ;;  %791 = vmatmul.bf16.gmra.mxu3 %v172_v42  ;;  %840 = vmatmul.bf16.gmra.mxu0 %v173_v43  ;;  %v186_v42 = vpack.c.bf16 %v130_v30, %v123_v19  ;;  %v187_v43 = vpack.c.bf16 %v131_v33, %v124_v31 }
  0xd2   :  { %v188_v47 = vpack.c.bf16 %v132_v22, %v125_v37 }
  0xd3   :  { %1566 = vmatmul.msk.bf16.gmra.mxu2 %vm586_vm0, %v175_v45  ;;  %889 = vmatmul.bf16.gmra.mxu1 %v174_v46  ;;  %v189_v46 = vpack.c.bf16 %v133_v35, %v126_v34 }
  0xd4   :  { %v645_v50 = vpop.f32.mrf.mxu3 }
  0xd5   :  { %v646_v51 = vadd.f32 %v2188_v32, %v645_v50 }
  0xd6   :  { %v743_v53 = vpop.f32.mrf.mxu2  ;;  %v2297_v54 = vpop.f32.mrf.mxu0 }
  0xd7   :  { %v695_v55 = vadd.f32 %v694_v48, %v646_v51 }
  0xd8   :  { %v696_v56 = vpop.f32.mrf.mxu1 }
  0xd9   :  { %v2299_v58 = vadd.f32 %v743_v53, %v695_v55 }
  0xdc   :  { %v647_v8 = vpop.f32.mrf.mxu3 }
  0xdd   :  { %v648_v9 = vadd.f32 %v2188_v32, %v647_v8  ;;  %v621_v8 = vadd.f32 %v2188_v32, %v2183_v16 }
  0xde   :  { %v745_v11 = vpop.f32.mrf.mxu2  ;;  %v718_v1 = vpop.f32.mrf.mxu0 }
  0xdf   :  { %v697_v4 = vadd.f32 %v696_v56, %v648_v9 }
  0xe0   :  { %v699_v18 = vpop.f32.mrf.mxu1 }
  0xe1   :  { %v2326_v20 = vadd.f32 %v745_v11, %v697_v4  ;;  %796 = vmatmul.bf16.gmra.mxu3 %v179_v12  ;;  %845 = vmatmul.bf16.gmra.mxu0 %v180_v14  ;;  %v670_v12 = vadd.f32 %v2256_v7, %v621_v8  ;;  %v2375_v7 = vld [vmem:[%s2499_s3] ss:$0 sm:$0xff] }
  0xe3   :  { %1567 = vmatmul.msk.bf16.gmra.mxu2 %vm586_vm0, %v182_v15  ;;  %894 = vmatmul.bf16.gmra.mxu1 %v181_v17  ;;  %v719_v15 = vadd.f32 %v718_v1, %v670_v12 }
  0xe4   :  { %v650_v21 = vpop.f32.mrf.mxu3 }
  0xe5   :  { %v651_v23 = vadd.f32 %v2188_v32, %v650_v21 }
  0xe6   :  { %v748_v25 = vpop.f32.mrf.mxu2  ;;  %v720_v26 = vpop.f32.mrf.mxu0 }
  0xe7   :  { %v700_v10 = vadd.f32 %v699_v18, %v651_v23  ;;  %v623_v23 = vadd.f32 %v2188_v32, %v2192_v36  ;;  %v626_v36 = vadd.f32 %v2188_v32, %v2221_v52 }
  0xe8   :  { %v701_v13 = vpop.f32.mrf.mxu1 }
  0xe9   :  { %v2330_v28 = vadd.f32 %v748_v25, %v700_v10 }
  0xec   :  { %v652_v39 = vpop.f32.mrf.mxu3 }
  0xed   :  { %v653_v40 = vadd.f32 %v2188_v32, %v652_v39 }
  0xee   :  { %v750_v41 = vpop.f32.mrf.mxu2  ;;  %v723_v45 = vpop.f32.mrf.mxu0 }
  0xef   :  { %v702_v48 = vadd.f32 %v701_v13, %v653_v40  ;;  %v672_v13 = vadd.f32 %v2262_v27, %v623_v23 }
  0xf0   :  { %v704_v50 = vpop.f32.mrf.mxu1 }
  0xf1   :  { %v2357_v51 = vadd.f32 %v750_v41, %v702_v48  ;;  %801 = vmatmul.bf16.gmra.mxu3 %v186_v42  ;;  %850 = vmatmul.bf16.gmra.mxu0 %v187_v43  ;;  %v721_v16 = vadd.f32 %v720_v26, %v672_v13  ;;  %v675_v26 = vadd.f32 %v2291_v44, %v626_v36 }
  0xf3   :  { %1568 = vmatmul.msk.bf16.gmra.mxu2 %vm586_vm0, %v189_v46  ;;  %899 = vmatmul.bf16.gmra.mxu1 %v188_v47  ;;  %v724_v40 = vadd.f32 %v723_v45, %v675_v26 }
  0xf4   :  { %v655_v53 = vpop.f32.mrf.mxu3 }
  0xf5   :  { %v656_v55 = vadd.f32 %v2188_v32, %v655_v53 }
  0xf6   :  { %v753_v56 = vpop.f32.mrf.mxu2  ;;  %v725_v59 = vpop.f32.mrf.mxu0 }
  0xf7   :  { %v705_v60 = vadd.f32 %v704_v50, %v656_v55  ;;  %v628_v50 = vadd.f32 %v2188_v32, %v2227_v61 }
  0xf8   :  { %v706_v62 = vpop.f32.mrf.mxu1 }
  0xf9   :  { %v2361_v63 = vadd.f32 %v753_v56, %v705_v60  ;;  %v677_v56 = vadd.f32 %v2297_v54, %v628_v50 }
  0xfb   :  { %v726_v44 = vadd.f32 %v725_v59, %v677_v56 }
  0xfc   :  { %v657_v2 = vpop.f32.mrf.mxu3 }
  0xfd   :  { %v658_v3 = vadd.f32 %v2188_v32, %v657_v2 }
  0xfe   :  { %v755_v5 = vpop.f32.mrf.mxu2  ;;  %v816_v6 = vpop.f32.mrf.mxu0 }
  0xff   :  { %v707_v9 = vadd.f32 %v706_v62, %v658_v3 }
 0x100   :  { %v865_v11 = vpop.f32.mrf.mxu1 }
 0x101   :  { %v2367_v14 = vadd.f32 %v755_v5, %v707_v9 }
 0x104   :  { %v767_v17 = vpop.f32.mrf.mxu3 }
 0x105   :  { %v768_v4 = vadd.f32 %v767_v17, %v719_v15 }
 0x106   :  { %v914_v18 = vpop.f32.mrf.mxu2  ;;  %v818_v21 = vpop.f32.mrf.mxu0 }
 0x107   :  { %v817_v25 = vadd.f32 %v816_v6, %v768_v4 }
 0x108   :  { %v867_v10 = vpop.f32.mrf.mxu1 }
 0x109   :  { %v866_v19 = vadd.f32 %v865_v11, %v817_v25 }
 0x10b   :  { %v915_v30 = vadd.f32 %v914_v18, %v866_v19 }
 0x10c   :  { %v769_v1 = vpop.f32.mrf.mxu3 }
 0x10d   :  { %v954_v31 = vmax.f32 %v915_v30, 0.0  ;;  %v770_v33 = vadd.f32 %v769_v1, %v721_v16 }
 0x10e   :  { %v916_v34 = vpop.f32.mrf.mxu2  ;;  %v821_v35 = vpop.f32.mrf.mxu0 }
 0x10f   :  { %v819_v37 = vadd.f32 %v818_v21, %v770_v33  ;;  %v974_v27 = vmul.f32 %v2375_v7, %v954_v31 }
 0x110   :  { %v870_v22 = vpop.f32.mrf.mxu1 }
 0x111   :  { %v868_v39 = vadd.f32 %v867_v10, %v819_v37  ;;  %990 = vadd.xlane.f32.xlu0 %v974_v27 }
 0x113   :  { %v917_v41 = vadd.f32 %v916_v34, %v868_v39 }
 0x114   :  { %v772_v42 = vpop.f32.mrf.mxu3 }
 0x115   :  { %v955_v43 = vmax.f32 %v917_v41, 0.0  ;;  %v773_v46 = vadd.f32 %v772_v42, %v724_v40 }
 0x116   :  { %v919_v47 = vpop.f32.mrf.mxu2  ;;  %v823_v48 = vpop.f32.mrf.mxu0 }
 0x117   :  { %v822_v53 = vadd.f32 %v821_v35, %v773_v46  ;;  %v975_v55 = vmul.f32 %v2375_v7, %v955_v43 }
 0x118   :  { %v872_v52 = vpop.f32.mrf.mxu1 }
 0x119   :  { %v871_v60 = vadd.f32 %v870_v22, %v822_v53  ;;  %992 = vadd.xlane.f32.xlu0 %v975_v55 }
 0x11b   :  { %v920_v62 = vadd.f32 %v919_v47, %v871_v60 }
 0x11c   :  { %v774_v45 = vpop.f32.mrf.mxu3 }
 0x11d   :  { %v956_v2 = vmax.f32 %v920_v62, 0.0  ;;  %v775_v3 = vadd.f32 %v774_v45, %v726_v44 }
 0x11e   :  { %v921_v5 = vpop.f32.mrf.mxu2  ;;  %v826_v6 = vpop.f32.mrf.mxu0 }
 0x11f   :  { %v824_v8 = vadd.f32 %v823_v48, %v775_v3  ;;  %v976_v11 = vmul.f32 %v2375_v7, %v956_v2 }
 0x120   :  { %v875_v9 = vpop.f32.mrf.mxu1 }
 0x121   :  { %v873_v32 = vadd.f32 %v872_v52, %v824_v8  ;;  %994 = vadd.xlane.f32.xlu1 %v976_v11 }
 0x123   :  { %v922_v61 = vadd.f32 %v921_v5, %v873_v32 }
 0x124   :  { %v777_v12 = vpop.f32.mrf.mxu3 }
 0x125   :  { %v957_v15 = vmax.f32 %v922_v61, 0.0  ;;  %v778_v54 = vadd.f32 %v777_v12, %v2194_v38 }
 0x126   :  { %v924_v17 = vpop.f32.mrf.mxu2  ;;  %v828_v4 = vpop.f32.mrf.mxu0 }
 0x127   :  { %v827_v59 = vadd.f32 %v826_v6, %v778_v54  ;;  %v977_v21 = vmul.f32 %v2375_v7, %v957_v15 }
 0x128   :  { %v877_v18 = vpop.f32.mrf.mxu1 }
 0x129   :  { %v876_v23 = vadd.f32 %v875_v9, %v827_v59  ;;  %996 = vadd.xlane.f32.xlu1 %v977_v21 }
 0x12b   :  { %v925_v25 = vadd.f32 %v924_v17, %v876_v23 }
 0x12c   :  { %v779_v10 = vpop.f32.mrf.mxu3 }
 0x12d   :  { %v958_v13 = vmax.f32 %v925_v25, 0.0  ;;  %v780_v19 = vadd.f32 %v779_v10, %v2223_v57 }
 0x12e   :  { %v926_v16 = vpop.f32.mrf.mxu2  ;;  %v831_v30 = vpop.f32.mrf.mxu0 }
 0x12f   :  { %v829_v1 = vadd.f32 %v828_v4, %v780_v19  ;;  %v978_v33 = vmul.f32 %v2375_v7, %v958_v13 }
 0x130   :  { %v880_v31 = vpop.f32.mrf.mxu1 }
 0x131   :  { %v878_v38 = vadd.f32 %v877_v18, %v829_v1  ;;  %998 = vadd.xlane.f32.xlu2 %v978_v33 }
 0x133   :  { %v927_v34 = vadd.f32 %v926_v16, %v878_v38 }
 0x134   :  { %v782_v35 = vpop.f32.mrf.mxu3 }
 0x135   :  { %v959_v36 = vmax.f32 %v927_v34, 0.0  ;;  %v783_v37 = vadd.f32 %v782_v35, %v2229_v0 }
 0x136   :  { %v929_v22 = vpop.f32.mrf.mxu2  ;;  %v833_v27 = vpop.f32.mrf.mxu0 }
 0x137   :  { %v832_v26 = vadd.f32 %v831_v30, %v783_v37  ;;  %v979_v40 = vmul.f32 %v2375_v7, %v959_v36 }
 0x138   :  { %v882_v39 = vpop.f32.mrf.mxu1 }
 0x139   :  { %v881_v57 = vadd.f32 %v880_v31, %v832_v26  ;;  %1000 = vadd.xlane.f32.xlu2 %v979_v40 }
 0x13b   :  { %v930_v41 = vadd.f32 %v929_v22, %v881_v57 }
 0x13c   :  { %v784_v42 = vpop.f32.mrf.mxu3 }
 0x13d   :  { %v960_v43 = vmax.f32 %v930_v41, 0.0  ;;  %v785_v46 = vadd.f32 %v784_v42, %v2258_v24 }
 0x13e   :  { %v931_v47 = vpop.f32.mrf.mxu2  ;;  %v836_v48 = vpop.f32.mrf.mxu0 }
 0x13f   :  { %v834_v50 = vadd.f32 %v833_v27, %v785_v46  ;;  %v980_v52 = vmul.f32 %v2375_v7, %v960_v43 }
 0x140   :  { %v885_v53 = vpop.f32.mrf.mxu1 }
 0x141   :  { %v883_v0 = vadd.f32 %v882_v39, %v834_v50  ;;  %1002 = vadd.xlane.f32.xlu0 %v980_v52 }
 0x143   :  { %v932_v55 = vadd.f32 %v931_v47, %v883_v0 }
 0x144   :  { %v787_v56 = vpop.f32.mrf.mxu3 }
 0x145   :  { %v961_v60 = vmax.f32 %v932_v55, 0.0  ;;  %v788_v44 = vadd.f32 %v787_v56, %v2264_v29 }
 0x146   :  { %v934_v62 = vpop.f32.mrf.mxu2  ;;  %v838_v45 = vpop.f32.mrf.mxu0 }
 0x147   :  { %v837_v2 = vadd.f32 %v836_v48, %v788_v44  ;;  %v981_v5 = vmul.f32 %v2375_v7, %v961_v60 }
 0x148   :  { %v887_v3 = vpop.f32.mrf.mxu1 }
 0x149   :  { %v886_v24 = vadd.f32 %v885_v53, %v837_v2  ;;  %1004 = vadd.xlane.f32.xlu1 %v981_v5 }
 0x14b   :  { %v935_v6 = vadd.f32 %v934_v62, %v886_v24 }
 0x14c   :  { %v789_v8 = vpop.f32.mrf.mxu3 }
 0x14d   :  { %v962_v9 = vmax.f32 %v935_v6, 0.0  ;;  %v790_v11 = vadd.f32 %v789_v8, %v2293_v49 }
 0x14e   :  { %v936_v32 = vpop.f32.mrf.mxu2  ;;  %v841_v61 = vpop.f32.mrf.mxu0 }
 0x14f   :  { %v839_v12 = vadd.f32 %v838_v45, %v790_v11  ;;  %v982_v54 = vmul.f32 %v2375_v7, %v962_v9 }
 0x150   :  { %v890_v15 = vpop.f32.mrf.mxu1 }
 0x151   :  { %v888_v29 = vadd.f32 %v887_v3, %v839_v12  ;;  %1006 = vadd.xlane.f32.xlu2 %v982_v54  ;;  %v2413_v12 = vstv %s2500_s4 }
 0x153   :  { %v937_v17 = vadd.f32 %v936_v32, %v888_v29 }
 0x154   :  { %v792_v4 = vpop.f32.mrf.mxu3 }
 0x155   :  { %v963_v59 = vmax.f32 %v937_v17, 0.0  ;;  %v793_v18 = vadd.f32 %v792_v4, %v2299_v58 }
 0x156   :  { %v939_v21 = vpop.f32.mrf.mxu2  ;;  %v843_v23 = vpop.f32.mrf.mxu0 }
 0x157   :  { %v842_v25 = vadd.f32 %v841_v61, %v793_v18  ;;  %v983_v10 = vmul.f32 %v2375_v7, %v963_v59 }
 0x158   :  { %v892_v13 = vpop.f32.mrf.mxu1 }
 0x159   :  { %v891_v49 = vadd.f32 %v890_v15, %v842_v25  ;;  %1008 = vadd.xlane.f32.xlu0 %v983_v10 }
 0x15b   :  { %v940_v19 = vadd.f32 %v939_v21, %v891_v49 }
 0x15c   :  { %v794_v16 = vpop.f32.mrf.mxu3 }
 0x15d   :  { %v964_v30 = vmax.f32 %v940_v19, 0.0  ;;  %v795_v1 = vadd.f32 %v794_v16, %v2326_v20 }
 0x15e   :  { %v941_v31 = vpop.f32.mrf.mxu2  ;;  %v846_v34 = vpop.f32.mrf.mxu0 }
 0x15f   :  { %v844_v33 = vadd.f32 %v843_v23, %v795_v1  ;;  %v984_v38 = vmul.f32 %v2375_v7, %v964_v30 }
 0x160   :  { %v895_v58 = vpop.f32.mrf.mxu1 }
 0x161   :  { %v893_v35 = vadd.f32 %v892_v13, %v844_v33  ;;  %1010 = vadd.xlane.f32.xlu1 %v984_v38 }
 0x163   :  { %v942_v36 = vadd.f32 %v941_v31, %v893_v35 }
 0x164   :  { %v797_v37 = vpop.f32.mrf.mxu3 }
 0x165   :  { %v965_v22 = vmax.f32 %v942_v36, 0.0  ;;  %v798_v27 = vadd.f32 %v797_v37, %v2330_v28 }
 0x166   :  { %v944_v26 = vpop.f32.mrf.mxu2  ;;  %v848_v20 = vpop.f32.mrf.mxu0 }
 0x167   :  { %v847_v39 = vadd.f32 %v846_v34, %v798_v27  ;;  %v985_v40 = vmul.f32 %v2375_v7, %v965_v22 }
 0x168   :  { %v897_v42 = vpop.f32.mrf.mxu1 }
 0x169   :  { %v896_v57 = vadd.f32 %v895_v58, %v847_v39  ;;  %1012 = vadd.xlane.f32.xlu2 %v985_v40 }
 0x16b   :  { %v945_v41 = vadd.f32 %v944_v26, %v896_v57 }
 0x16c   :  { %v799_v43 = vpop.f32.mrf.mxu3 }
 0x16d   :  { %v966_v46 = vmax.f32 %v945_v41, 0.0  ;;  %v800_v47 = vadd.f32 %v799_v43, %v2357_v51 }
 0x16e   :  { %v946_v48 = vpop.f32.mrf.mxu2  ;;  %v851_v0 = vpop.f32.mrf.mxu0 }
 0x16f   :  { %v849_v50 = vadd.f32 %v848_v20, %v800_v47  ;;  %v986_v53 = vmul.f32 %v2375_v7, %v966_v46 }
 0x170   :  { %v900_v44 = vpop.f32.mrf.mxu1 }
 0x171   :  { %v898_v52 = vadd.f32 %v897_v42, %v849_v50  ;;  %1014 = vadd.xlane.f32.xlu0 %v986_v53 }
 0x173   :  { %v947_v28 = vadd.f32 %v946_v48, %v898_v52 }
 0x174   :  { %v802_v55 = vpop.f32.mrf.mxu3 }
 0x175   :  { %v967_v56 = vmax.f32 %v947_v28, 0.0  ;;  %v803_v60 = vadd.f32 %v802_v55, %v2361_v63 }
 0x176   :  { %v949_v2 = vpop.f32.mrf.mxu2  ;;  %v853_v8 = vpop.f32.mrf.mxu0 }
 0x177   :  { %v852_v62 = vadd.f32 %v851_v0, %v803_v60  ;;  %v987_v45 = vmul.f32 %v2375_v7, %v967_v56 }
 0x178   :  { %v902_v32 = vpop.f32.mrf.mxu1 }
 0x179   :  { %v901_v3 = vadd.f32 %v900_v44, %v852_v62  ;;  %1016 = vadd.xlane.f32.xlu1 %v987_v45 }
 0x17b   :  { %v950_v51 = vadd.f32 %v949_v2, %v901_v3 }
 0x17c   :  { %v804_v5 = vpop.f32.mrf.mxu3 }
 0x17d   :  { %v968_v24 = vmax.f32 %v950_v51, 0.0  ;;  %v805_v6 = vadd.f32 %v804_v5, %v2367_v14 }
 0x17e   :  { %v951_v63 = vpop.f32.mrf.mxu2 }
 0x17f   :  { %v854_v9 = vadd.f32 %v853_v8, %v805_v6  ;;  %v988_v11 = vmul.f32 %v2375_v7, %v968_v24 }
 0x181   :  { %v903_v61 = vadd.f32 %v902_v32, %v854_v9  ;;  %1018 = vadd.xlane.f32.xlu2 %v988_v11 }
 0x183   :  { %v952_v15 = vadd.f32 %v951_v63, %v903_v61 }
 0x184   :  { %v991_v54 = vpop.xlane.xlu0 %990 }
 0x185   :  { %v969_v29 = vmax.f32 %v952_v15, 0.0  ;;  %v1024_v17 = vadd.f32 %v2413_v12, %v991_v54 }
 0x187   :  { %v1569_v4 = vmul.f32 -1.442695, %v1024_v17  ;;  %v989_v14 = vmul.f32 %v2375_v7, %v969_v29 }
 0x189   :  { %1660 = vpow2.f32 %v1569_v4  ;;  %1020 = vadd.xlane.f32.xlu0 %v989_v14 }
 0x18c   :  { %v993_v59 = vpop.xlane.xlu0 %992 }
 0x18d   :  { %v1025_v18 = vadd.f32 %v2413_v12, %v993_v59 }
 0x18f   :  { %v1661_v21 = vpop.eup %1660  ;;  %v1570_v23 = vmul.f32 -1.442695, %v1025_v18 }
 0x190   :  { %v1088_v25 = vadd.f32 1.0, %v1661_v21 }
 0x191   :  { %1662 = vpow2.f32 %v1570_v23 }
 0x192   :  { %1664 = vrcp.f32 %v1088_v25  ;;  %v1115_v31 = vand.u32 2147483648, %v1088_v25  ;;  %v1113_v34 = vand.u32 2147483647, %v1088_v25  ;;  %vm1109_vm2 = vweird.f32 %v1088_v25 }
 0x194   :  { %v995_v10 = vpop.xlane.xlu1 %994  ;;  %v1116_v27 = vor.u32 1.1754944e-38, %v1115_v31  ;;  %vm1114_vm5 = vcmp.eq.f32.partialorder %v1113_v34, 8.507059e+37 }
 0x195   :  { %v1026_v13 = vadd.f32 %v2413_v12, %v995_v10 }
 0x197   :  { %v1663_v49 = vpop.eup %1662  ;;  %v1571_v19 = vmul.f32 -1.442695, %v1026_v13 }
 0x198   :  { %v1665_v16 = vpop.eup %1664  ;;  %v1089_v30 = vadd.f32 1.0, %v1663_v49 }
 0x199   :  { %v1105_v1 = vmul.f32 %v1665_v16, %v1088_v25  ;;  %1666 = vpow2.f32 %v1571_v19  ;;  %vm1110_vm1 = vweird.f32 %v1665_v16 }
 0x19a   :  { %1668 = vrcp.f32 %v1089_v30  ;;  %vm1111_vm4 = vmor %vm1109_vm2, %vm1110_vm1  ;;  %v1130_v41 = vand.u32 2147483648, %v1089_v30  ;;  %v1128_v46 = vand.u32 2147483647, %v1089_v30  ;;  %vm1124_vm7 = vweird.f32 %v1089_v30 }
 0x19b   :  { %v1106_v7 = vsub.f32 1.0, %v1105_v1 }
 0x19c   :  { %v997_v33 = vpop.xlane.xlu1 %996  ;;  %v1131_v28 = vor.u32 1.1754944e-38, %v1130_v41  ;;  %vm1129_vm9 = vcmp.eq.f32.partialorder %v1128_v46, 8.507059e+37 }
 0x19d   :  { %v1107_v38 = vmul.f32 %v1665_v16, %v1106_v7  ;;  %v1027_v35 = vadd.f32 %v2413_v12, %v997_v33 }
 0x19f   :  { %v1667_v58 = vpop.eup %1666  ;;  %v1108_v36 = vadd.f32 %v1665_v16, %v1107_v38  ;;  %v1572_v37 = vmul.f32 -1.442695, %v1027_v35 }
 0x1a0   :  { %v1669_v22 = vpop.eup %1668  ;;  %v1090_v26 = vadd.f32 1.0, %v1667_v58 }
 0x1a1   :  { %v1112_v39 = vsel %vm1111_vm4, %v1665_v16, %v1108_v36  ;;  %v1120_v40 = vmul.f32 %v1669_v22, %v1089_v30  ;;  %1670 = vpow2.f32 %v1572_v37  ;;  %vm1125_vm6 = vweird.f32 %v1669_v22 }
 0x1a2   :  { %v1117_v57 = vsel %vm1114_vm5, %v1116_v27, %v1112_v39  ;;  %1672 = vrcp.f32 %v1090_v26  ;;  %vm1126_vm8 = vmor %vm1124_vm7, %vm1125_vm6  ;;  %v1145_v62 = vand.u32 2147483648, %v1090_v26  ;;  %v1143_v3 = vand.u32 2147483647, %v1090_v26 }
 0x1a3   :  { %1345 = vst.msk [vmem:[%s2501_s5] sm:$0xff] %vm1344_vm3, %v1117_v57  ;;  %v1121_v20 = vsub.f32 1.0, %v1120_v40  ;;  %vm1139_vm11 = vweird.f32 %v1090_v26 }
 0x1a4   :  { %v999_v42 = vpop.xlane.xlu2 %998  ;;  %v1146_v9 = vor.u32 1.1754944e-38, %v1145_v62  ;;  %vm1144_vm13 = vcmp.eq.f32.partialorder %v1143_v3, 8.507059e+37 }
 0x1a5   :  { %v1122_v43 = vmul.f32 %v1669_v22, %v1121_v20  ;;  %v1028_v47 = vadd.f32 %v2413_v12, %v999_v42 }
 0x1a7   :  { %v1671_v48 = vpop.eup %1670  ;;  %v1123_v50 = vadd.f32 %v1669_v22, %v1122_v43  ;;  %v1573_v53 = vmul.f32 -1.442695, %v1028_v47 }
 0x1a8   :  { %v1673_v52 = vpop.eup %1672  ;;  %v1091_v0 = vadd.f32 1.0, %v1671_v48 }
 0x1a9   :  { %v1127_v55 = vsel %vm1126_vm8, %v1669_v22, %v1123_v50  ;;  %v1135_v56 = vmul.f32 %v1673_v52, %v1090_v26  ;;  %1674 = vpow2.f32 %v1573_v53  ;;  %vm1140_vm10 = vweird.f32 %v1673_v52 }
 0x1aa   :  { %v1132_v60 = vsel %vm1129_vm9, %v1131_v28, %v1127_v55  ;;  %1676 = vrcp.f32 %v1091_v0  ;;  %vm1141_vm12 = vmor %vm1139_vm11, %vm1140_vm10  ;;  %v1160_v54 = vand.u32 2147483648, %v1091_v0  ;;  %v1158_v4 = vand.u32 2147483647, %v1091_v0 }
 0x1ab   :  { %1346 = vst.msk [vmem:[%s2501_s5 + $0x8] sm:$0xff] %vm1344_vm3, %v1132_v60  ;;  %v1136_v44 = vsub.f32 1.0, %v1135_v56  ;;  %vm1154_vm15 = vweird.f32 %v1091_v0 }
 0x1ac   :  { %v1001_v45 = vpop.xlane.xlu2 %1000  ;;  %v1161_v25 = vor.u32 1.1754944e-38, %v1160_v54  ;;  %vm1159_vm1 = vcmp.eq.f32.partialorder %v1158_v4, 8.507059e+37 }
 0x1ad   :  { %v1137_v2 = vmul.f32 %v1673_v52, %v1136_v44  ;;  %v1029_v51 = vadd.f32 %v2413_v12, %v1001_v45 }
 0x1af   :  { %v1675_v5 = vpop.eup %1674  ;;  %v1138_v24 = vadd.f32 %v1673_v52, %v1137_v2  ;;  %v1574_v6 = vmul.f32 -1.442695, %v1029_v51 }
 0x1b0   :  { %v1677_v8 = vpop.eup %1676  ;;  %v1092_v11 = vadd.f32 1.0, %v1675_v5 }
 0x1b1   :  { %v1142_v32 = vsel %vm1141_vm12, %v1673_v52, %v1138_v24  ;;  %v1150_v61 = vmul.f32 %v1677_v8, %v1091_v0  ;;  %1678 = vpow2.f32 %v1574_v6  ;;  %vm1155_vm14 = vweird.f32 %v1677_v8 }
 0x1b2   :  { %v1147_v63 = vsel %vm1144_vm13, %v1146_v9, %v1142_v32  ;;  %1680 = vrcp.f32 %v1092_v11  ;;  %vm1156_vm0 = vmor %vm1154_vm15, %vm1155_vm14  ;;  %v1175_v30 = vand.u32 2147483648, %v1092_v11  ;;  %v1173_v31 = vand.u32 2147483647, %v1092_v11 }
 0x1b3   :  { %1347 = vst.msk [vmem:[%s2501_s5 + $0x10] sm:$0xff] %vm1344_vm3, %v1147_v63  ;;  %v1151_v15 = vsub.f32 1.0, %v1150_v61  ;;  %vm1169_vm4 = vweird.f32 %v1092_v11 }
 0x1b4   :  { %v1003_v29 = vpop.xlane.xlu0 %1002  ;;  %v1176_v36 = vor.u32 1.1754944e-38, %v1175_v30  ;;  %vm1174_vm6 = vcmp.eq.f32.partialorder %v1173_v31, 8.507059e+37 }
 0x1b5   :  { %v1152_v17 = vmul.f32 %v1677_v8, %v1151_v15  ;;  %v1030_v14 = vadd.f32 %v2413_v12, %v1003_v29 }
 0x1b7   :  { %v1679_v59 = vpop.eup %1678  ;;  %v1153_v18 = vadd.f32 %v1677_v8, %v1152_v17  ;;  %v1575_v21 = vmul.f32 -1.442695, %v1030_v14 }
 0x1b8   :  { %v1681_v23 = vpop.eup %1680  ;;  %v1093_v10 = vadd.f32 1.0, %v1679_v59 }
 0x1b9   :  { %v1157_v13 = vsel %vm1156_vm0, %v1677_v8, %v1153_v18  ;;  %v1165_v49 = vmul.f32 %v1681_v23, %v1092_v11  ;;  %1682 = vpow2.f32 %v1575_v21  ;;  %vm1170_vm2 = vweird.f32 %v1681_v23 }
 0x1ba   :  { %v1162_v19 = vsel %vm1159_vm1, %v1161_v25, %v1157_v13  ;;  %1684 = vrcp.f32 %v1093_v10  ;;  %vm1171_vm5 = vmor %vm1169_vm4, %vm1170_vm2  ;;  %v1190_v40 = vand.u32 2147483648, %v1093_v10  ;;  %v1188_v41 = vand.u32 2147483647, %v1093_v10 }
 0x1bb   :  { %1348 = vst.msk [vmem:[%s2501_s5 + $0x18] sm:$0xff] %vm1344_vm3, %v1162_v19  ;;  %v1166_v16 = vsub.f32 1.0, %v1165_v49  ;;  %vm1184_vm8 = vweird.f32 %v1093_v10 }
 0x1bc   :  { %v1005_v1 = vpop.xlane.xlu1 %1004  ;;  %v1191_v50 = vor.u32 1.1754944e-38, %v1190_v40  ;;  %vm1189_vm10 = vcmp.eq.f32.partialorder %v1188_v41, 8.507059e+37 }
 0x1bd   :  { %v1167_v7 = vmul.f32 %v1681_v23, %v1166_v16  ;;  %v1031_v33 = vadd.f32 %v2413_v12, %v1005_v1 }
 0x1bf   :  { %v1683_v38 = vpop.eup %1682  ;;  %v1168_v34 = vadd.f32 %v1681_v23, %v1167_v7  ;;  %v1576_v35 = vmul.f32 -1.442695, %v1031_v33 }
 0x1c0   :  { %v1685_v58 = vpop.eup %1684  ;;  %v1094_v37 = vadd.f32 1.0, %v1683_v38 }
 0x1c1   :  { %v1172_v22 = vsel %vm1171_vm5, %v1681_v23, %v1168_v34  ;;  %v1180_v27 = vmul.f32 %v1685_v58, %v1093_v10  ;;  %1686 = vpow2.f32 %v1576_v35  ;;  %vm1185_vm7 = vweird.f32 %v1685_v58 }
 0x1c2   :  { %v1177_v26 = vsel %vm1174_vm6, %v1176_v36, %v1172_v22  ;;  %1688 = vrcp.f32 %v1094_v37  ;;  %vm1186_vm9 = vmor %vm1184_vm8, %vm1185_vm7  ;;  %v1205_v56 = vand.u32 2147483648, %v1094_v37  ;;  %v1203_v62 = vand.u32 2147483647, %v1094_v37 }
 0x1c3   :  { %1349 = vst.msk [vmem:[%s2501_s5 + $0x20] sm:$0xff] %vm1344_vm3, %v1177_v26  ;;  %v1181_v39 = vsub.f32 1.0, %v1180_v27  ;;  %vm1199_vm12 = vweird.f32 %v1094_v37 }
 0x1c4   :  { %v1007_v57 = vpop.xlane.xlu2 %1006  ;;  %v1206_v24 = vor.u32 1.1754944e-38, %v1205_v56  ;;  %vm1204_vm14 = vcmp.eq.f32.partialorder %v1203_v62, 8.507059e+37 }
 0x1c5   :  { %v1182_v20 = vmul.f32 %v1685_v58, %v1181_v39  ;;  %v1032_v42 = vadd.f32 %v2413_v12, %v1007_v57 }
 0x1c7   :  { %v1687_v43 = vpop.eup %1686  ;;  %v1183_v46 = vadd.f32 %v1685_v58, %v1182_v20  ;;  %v1577_v47 = vmul.f32 -1.442695, %v1032_v42 }
 0x1c8   :  { %v1689_v48 = vpop.eup %1688  ;;  %v1095_v53 = vadd.f32 1.0, %v1687_v43 }
 0x1c9   :  { %v1187_v52 = vsel %vm1186_vm9, %v1685_v58, %v1183_v46  ;;  %v1195_v28 = vmul.f32 %v1689_v48, %v1094_v37  ;;  %1690 = vpow2.f32 %v1577_v47  ;;  %vm1200_vm11 = vweird.f32 %v1689_v48 }
 0x1ca   :  { %v1192_v0 = vsel %vm1189_vm10, %v1191_v50, %v1187_v52  ;;  %1692 = vrcp.f32 %v1095_v53  ;;  %vm1201_vm13 = vmor %vm1199_vm12, %vm1200_vm11  ;;  %v1220_v61 = vand.u32 2147483648, %v1095_v53  ;;  %v1218_v54 = vand.u32 2147483647, %v1095_v53 }
 0x1cb   :  { %1350 = vst.msk [vmem:[%s2501_s5 + $0x28] sm:$0xff] %vm1344_vm3, %v1192_v0  ;;  %v1196_v55 = vsub.f32 1.0, %v1195_v28  ;;  %vm1214_vm0 = vweird.f32 %v1095_v53 }
 0x1cc   :  { %v1009_v60 = vpop.xlane.xlu0 %1008  ;;  %v1221_v18 = vor.u32 1.1754944e-38, %v1220_v61  ;;  %vm1219_vm2 = vcmp.eq.f32.partialorder %v1218_v54, 8.507059e+37 }
 0x1cd   :  { %v1197_v44 = vmul.f32 %v1689_v48, %v1196_v55  ;;  %v1033_v45 = vadd.f32 %v2413_v12, %v1009_v60 }
 0x1cf   :  { %v1691_v2 = vpop.eup %1690  ;;  %v1198_v3 = vadd.f32 %v1689_v48, %v1197_v44  ;;  %v1578_v51 = vmul.f32 -1.442695, %v1033_v45 }
 0x1d0   :  { %v1693_v5 = vpop.eup %1692  ;;  %v1096_v6 = vadd.f32 1.0, %v1691_v2 }
 0x1d1   :  { %v1202_v8 = vsel %vm1201_vm13, %v1689_v48, %v1198_v3  ;;  %v1210_v9 = vmul.f32 %v1693_v5, %v1095_v53  ;;  %1694 = vpow2.f32 %v1578_v51  ;;  %vm1215_vm15 = vweird.f32 %v1693_v5 }
 0x1d2   :  { %v1207_v11 = vsel %vm1204_vm14, %v1206_v24, %v1202_v8  ;;  %1696 = vrcp.f32 %v1096_v6  ;;  %vm1216_vm1 = vmor %vm1214_vm0, %vm1215_vm15  ;;  %v1235_v49 = vand.u32 2147483648, %v1096_v6  ;;  %v1233_v30 = vand.u32 2147483647, %v1096_v6 }
 0x1d3   :  { %1351 = vst.msk [vmem:[%s2501_s5 + $0x30] sm:$0xff] %vm1344_vm3, %v1207_v11  ;;  %v1211_v32 = vsub.f32 1.0, %v1210_v9  ;;  %vm1229_vm5 = vweird.f32 %v1096_v6 }
 0x1d4   :  { %v1011_v63 = vpop.xlane.xlu1 %1010  ;;  %v1236_v34 = vor.u32 1.1754944e-38, %v1235_v49  ;;  %vm1234_vm7 = vcmp.eq.f32.partialorder %v1233_v30, 8.507059e+37 }
 0x1d5   :  { %v1212_v15 = vmul.f32 %v1693_v5, %v1211_v32  ;;  %v1034_v29 = vadd.f32 %v2413_v12, %v1011_v63 }
 0x1d7   :  { %v1695_v17 = vpop.eup %1694  ;;  %v1213_v4 = vadd.f32 %v1693_v5, %v1212_v15  ;;  %v1579_v14 = vmul.f32 -1.442695, %v1034_v29 }
 0x1d8   :  { %v1697_v59 = vpop.eup %1696  ;;  %v1097_v21 = vadd.f32 1.0, %v1695_v17 }
 0x1d9   :  { %v1217_v23 = vsel %vm1216_vm1, %v1693_v5, %v1213_v4  ;;  %v1225_v25 = vmul.f32 %v1697_v59, %v1096_v6  ;;  %1698 = vpow2.f32 %v1579_v14  ;;  %vm1230_vm4 = vweird.f32 %v1697_v59 }
 0x1da   :  { %v1222_v10 = vsel %vm1219_vm2, %v1221_v18, %v1217_v23  ;;  %1700 = vrcp.f32 %v1097_v21  ;;  %vm1231_vm6 = vmor %vm1229_vm5, %vm1230_vm4  ;;  %v1250_v27 = vand.u32 2147483648, %v1097_v21  ;;  %v1248_v40 = vand.u32 2147483647, %v1097_v21 }
 0x1db   :  { %1352 = vst.msk [vmem:[%s2501_s5 + $0x38] sm:$0xff] %vm1344_vm3, %v1222_v10  ;;  %v1226_v13 = vsub.f32 1.0, %v1225_v25  ;;  %vm1244_vm9 = vweird.f32 %v1097_v21 }
 0x1dc   :  { %v1013_v19 = vpop.xlane.xlu2 %1012  ;;  %v1251_v46 = vor.u32 1.1754944e-38, %v1250_v27  ;;  %vm1249_vm11 = vcmp.eq.f32.partialorder %v1248_v40, 8.507059e+37 }
 0x1dd   :  { %v1227_v16 = vmul.f32 %v1697_v59, %v1226_v13  ;;  %v1035_v1 = vadd.f32 %v2413_v12, %v1013_v19 }
 0x1df   :  { %v1699_v7 = vpop.eup %1698  ;;  %v1228_v31 = vadd.f32 %v1697_v59, %v1227_v16  ;;  %v1580_v33 = vmul.f32 -1.442695, %v1035_v1 }
 0x1e0   :  { %v1701_v38 = vpop.eup %1700  ;;  %v1098_v35 = vadd.f32 1.0, %v1699_v7 }
 0x1e1   :  { %v1232_v58 = vsel %vm1231_vm6, %v1697_v59, %v1228_v31  ;;  %v1240_v36 = vmul.f32 %v1701_v38, %v1097_v21  ;;  %1702 = vpow2.f32 %v1580_v33  ;;  %vm1245_vm8 = vweird.f32 %v1701_v38 }
 0x1e2   :  { %v1237_v37 = vsel %vm1234_vm7, %v1236_v34, %v1232_v58  ;;  %1704 = vrcp.f32 %v1098_v35  ;;  %vm1246_vm10 = vmor %vm1244_vm9, %vm1245_vm8  ;;  %v1265_v28 = vand.u32 2147483648, %v1098_v35  ;;  %v1263_v56 = vand.u32 2147483647, %v1098_v35 }
 0x1e3   :  { %1353 = vst.msk [vmem:[%s2501_s5 + $0x40] sm:$0xff] %vm1344_vm3, %v1237_v37  ;;  %v1241_v22 = vsub.f32 1.0, %v1240_v36  ;;  %vm1259_vm13 = vweird.f32 %v1098_v35 }
 0x1e4   :  { %v1015_v26 = vpop.xlane.xlu0 %1014  ;;  %v1266_v3 = vor.u32 1.1754944e-38, %v1265_v28  ;;  %vm1264_vm15 = vcmp.eq.f32.partialorder %v1263_v56, 8.507059e+37 }
 0x1e5   :  { %v1242_v39 = vmul.f32 %v1701_v38, %v1241_v22  ;;  %v1036_v57 = vadd.f32 %v2413_v12, %v1015_v26 }
 0x1e7   :  { %v1703_v20 = vpop.eup %1702  ;;  %v1243_v41 = vadd.f32 %v1701_v38, %v1242_v39  ;;  %v1581_v42 = vmul.f32 -1.442695, %v1036_v57 }
 0x1e8   :  { %v1705_v43 = vpop.eup %1704  ;;  %v1099_v47 = vadd.f32 1.0, %v1703_v20 }
 0x1e9   :  { %v1247_v48 = vsel %vm1246_vm10, %v1701_v38, %v1243_v41  ;;  %v1255_v50 = vmul.f32 %v1705_v43, %v1098_v35  ;;  %1706 = vpow2.f32 %v1581_v42  ;;  %vm1260_vm12 = vweird.f32 %v1705_v43 }
 0x1ea   :  { %v1252_v53 = vsel %vm1249_vm11, %v1251_v46, %v1247_v48  ;;  %1708 = vrcp.f32 %v1099_v47  ;;  %vm1261_vm14 = vmor %vm1259_vm13, %vm1260_vm12  ;;  %v1280_v9 = vand.u32 2147483648, %v1099_v47  ;;  %v1278_v61 = vand.u32 2147483647, %v1099_v47 }
 0x1eb   :  { %1354 = vst.msk [vmem:[%s2501_s5 + $0x48] sm:$0xff] %vm1344_vm3, %v1252_v53  ;;  %v1256_v52 = vsub.f32 1.0, %v1255_v50  ;;  %vm1274_vm1 = vweird.f32 %v1099_v47 }
 0x1ec   :  { %v1017_v0 = vpop.xlane.xlu1 %1016  ;;  %v1281_v4 = vor.u32 1.1754944e-38, %v1280_v9  ;;  %vm1279_vm4 = vcmp.eq.f32.partialorder %v1278_v61, 8.507059e+37 }
 0x1ed   :  { %v1257_v55 = vmul.f32 %v1705_v43, %v1256_v52  ;;  %v1037_v60 = vadd.f32 %v2413_v12, %v1017_v0 }
 0x1ef   :  { %v1707_v44 = vpop.eup %1706  ;;  %v1258_v62 = vadd.f32 %v1705_v43, %v1257_v55  ;;  %v1582_v45 = vmul.f32 -1.442695, %v1037_v60 }
 0x1f0   :  { %v1709_v2 = vpop.eup %1708  ;;  %v1100_v51 = vadd.f32 1.0, %v1707_v44 }
 0x1f1   :  { %v1262_v5 = vsel %vm1261_vm14, %v1705_v43, %v1258_v62  ;;  %v1270_v24 = vmul.f32 %v1709_v2, %v1099_v47  ;;  %1710 = vpow2.f32 %v1582_v45  ;;  %vm1275_vm0 = vweird.f32 %v1709_v2 }
 0x1f2   :  { %v1267_v6 = vsel %vm1264_vm15, %v1266_v3, %v1262_v5  ;;  %1712 = vrcp.f32 %v1100_v51  ;;  %vm1276_vm2 = vmor %vm1274_vm1, %vm1275_vm0  ;;  %v1295_v25 = vand.u32 2147483648, %v1100_v51  ;;  %v1293_v49 = vand.u32 2147483647, %v1100_v51 }
 0x1f3   :  { %1355 = vst.msk [vmem:[%s2501_s5 + $0x50] sm:$0xff] %vm1344_vm3, %v1267_v6  ;;  %v1271_v8 = vsub.f32 1.0, %v1270_v24  ;;  %vm1289_vm6 = vweird.f32 %v1100_v51 }
 0x1f4   :  { %v1019_v11 = vpop.xlane.xlu2 %1018  ;;  %v1296_v31 = vor.u32 1.1754944e-38, %v1295_v25  ;;  %vm1294_vm8 = vcmp.eq.f32.partialorder %v1293_v49, 8.507059e+37 }
 0x1f5   :  { %v1272_v32 = vmul.f32 %v1709_v2, %v1271_v8  ;;  %v1038_v63 = vadd.f32 %v2413_v12, %v1019_v11 }
 0x1f7   :  { %v1711_v15 = vpop.eup %1710  ;;  %v1273_v54 = vadd.f32 %v1709_v2, %v1272_v32  ;;  %v1583_v29 = vmul.f32 -1.442695, %v1038_v63 }
 0x1f8   :  { %v1713_v17 = vpop.eup %1712  ;;  %v1101_v14 = vadd.f32 1.0, %v1711_v15 }
 0x1f9   :  { %v1277_v59 = vsel %vm1276_vm2, %v1709_v2, %v1273_v54  ;;  %v1285_v18 = vmul.f32 %v1713_v17, %v1100_v51  ;;  %1714 = vpow2.f32 %v1583_v29  ;;  %vm1290_vm5 = vweird.f32 %v1713_v17 }
 0x1fa   :  { %v1282_v21 = vsel %vm1279_vm4, %v1281_v4, %v1277_v59  ;;  %1716 = vrcp.f32 %v1101_v14  ;;  %vm1291_vm7 = vmor %vm1289_vm6, %vm1290_vm5  ;;  %v1310_v58 = vand.u32 2147483648, %v1101_v14  ;;  %v1308_v37 = vand.u32 2147483647, %v1101_v14 }
 0x1fb   :  { %1356 = vst.msk [vmem:[%s2501_s5 + $0x58] sm:$0xff] %vm1344_vm3, %v1282_v21  ;;  %v1286_v23 = vsub.f32 1.0, %v1285_v18  ;;  %vm1304_vm10 = vweird.f32 %v1101_v14 }
 0x1fc   :  { %v1021_v10 = vpop.xlane.xlu0 %1020  ;;  %v1311_v39 = vor.u32 1.1754944e-38, %v1310_v58  ;;  %vm1309_vm12 = vcmp.eq.f32.partialorder %v1308_v37, 8.507059e+37 }
 0x1fd   :  { %v1287_v13 = vmul.f32 %v1713_v17, %v1286_v23  ;;  %v1039_v19 = vadd.f32 %v2413_v12, %v1021_v10 }
 0x1ff   :  { %v1715_v16 = vpop.eup %1714  ;;  %v1288_v30 = vadd.f32 %v1713_v17, %v1287_v13  ;;  %v1584_v1 = vmul.f32 -1.442695, %v1039_v19 }
 0x200   :  { %v1717_v7 = vpop.eup %1716  ;;  %v1102_v33 = vadd.f32 1.0, %v1715_v16 }
 0x201   :  { %v1292_v38 = vsel %vm1291_vm7, %v1713_v17, %v1288_v30  ;;  %v1300_v34 = vmul.f32 %v1717_v7, %v1101_v14  ;;  %1718 = vpow2.f32 %v1584_v1  ;;  %vm1305_vm9 = vweird.f32 %v1717_v7 }
 0x202   :  { %v1297_v35 = vsel %vm1294_vm8, %v1296_v31, %v1292_v38  ;;  %1720 = vrcp.f32 %v1102_v33  ;;  %vm1306_vm11 = vmor %vm1304_vm10, %vm1305_vm9  ;;  %v1325_v43 = vand.u32 2147483648, %v1102_v33  ;;  %v1323_v47 = vand.u32 2147483647, %v1102_v33 }
 0x203   :  { %1357 = vst.msk [vmem:[%s2501_s5 + $0x60] sm:$0xff] %vm1344_vm3, %v1297_v35  ;;  %v1301_v12 = vsub.f32 1.0, %v1300_v34  ;;  %vm1319_vm14 = vweird.f32 %v1102_v33 }
 0x204   :  { %v1326_v53 = vor.u32 1.1754944e-38, %v1325_v43  ;;  %vm1324_vm0 = vcmp.eq.f32.partialorder %v1323_v47, 8.507059e+37 }
 0x205   :  { %v1302_v36 = vmul.f32 %v1717_v7, %v1301_v12 }
 0x207   :  { %v1719_v22 = vpop.eup %1718  ;;  %v1303_v27 = vadd.f32 %v1717_v7, %v1302_v36 }
 0x208   :  { %v1721_v26 = vpop.eup %1720  ;;  %v1103_v40 = vadd.f32 1.0, %v1719_v22 }
 0x209   :  { %v1307_v57 = vsel %vm1306_vm11, %v1717_v7, %v1303_v27  ;;  %v1315_v20 = vmul.f32 %v1721_v26, %v1102_v33  ;;  %vm1320_vm13 = vweird.f32 %v1721_v26 }
 0x20a   :  { %v1312_v41 = vsel %vm1309_vm12, %v1311_v39, %v1307_v57  ;;  %1722 = vrcp.f32 %v1103_v40  ;;  %vm1321_vm15 = vmor %vm1319_vm14, %vm1320_vm13  ;;  %v1340_v56 = vand.u32 2147483648, %v1103_v40  ;;  %v1338_v44 = vand.u32 2147483647, %v1103_v40 }
 0x20b   :  { %1358 = vst.msk [vmem:[%s2501_s5 + $0x68] sm:$0xff] %vm1344_vm3, %v1312_v41  ;;  %v1316_v42 = vsub.f32 1.0, %v1315_v20  ;;  %vm1334_vm2 = vweird.f32 %v1103_v40 }
 0x20c   :  { %v1341_v45 = vor.u32 1.1754944e-38, %v1340_v56  ;;  %vm1339_vm5 = vcmp.eq.f32.partialorder %v1338_v44, 8.507059e+37 }
 0x20d   :  { %v1317_v46 = vmul.f32 %v1721_v26, %v1316_v42 }
 0x20f   :  { %v1318_v48 = vadd.f32 %v1721_v26, %v1317_v46 }
 0x210   :  { %v1723_v50 = vpop.eup %1722 }
 0x211   :  { %v1322_v52 = vsel %vm1321_vm15, %v1721_v26, %v1318_v48  ;;  %v1330_v28 = vmul.f32 %v1723_v50, %v1103_v40  ;;  %vm1335_vm1 = vweird.f32 %v1723_v50 }
 0x212   :  { %v1327_v0 = vsel %vm1324_vm0, %v1326_v53, %v1322_v52  ;;  %vm1336_vm4 = vmor %vm1334_vm2, %vm1335_vm1 }
 0x213   :  { %1359 = vst.msk [vmem:[%s2501_s5 + $0x70] sm:$0xff] %vm1344_vm3, %v1327_v0  ;;  %v1331_v55 = vsub.f32 1.0, %v1330_v28 }
 0x215   :  { %v1332_v60 = vmul.f32 %v1723_v50, %v1331_v55 }
 0x217   :  { %v1333_v62 = vadd.f32 %v1723_v50, %v1332_v60 }
 0x219   :  { %v1337_v2 = vsel %vm1336_vm4, %v1723_v50, %v1333_v62 }
 0x21a   :  { %v1342_v3 = vsel %vm1339_vm5, %v1341_v45, %v1337_v2 }
 0x21b   :  { %1360 = vst.msk [vmem:[%s2501_s5 + $0x78] sm:$0xff] %vm1344_vm3, %v1342_v3 }

</bundles_post_ra>
